<compile_context>
chip_gen: v7x
topology: tpu7x:2x2x1
jax: 0.10.0
libtpu: 0.0.40
codegen_flags: <defaults>
</compile_context>

<pallas_src>
import functools
from functools import partial

import jax
import jax.numpy as jnp
from jax.experimental import pallas as pl
from jax.experimental.pallas import tpu as pltpu


def _round_up(x, m):
    return (x + m - 1) // m * m


def _is_multi_tensorcore_chip():
    """Best-effort detection of chips with >1 TensorCore per chip (v7x)."""
    try:
        kind = jax.devices()[0].device_kind.lower()
    except Exception:
        return False
    return ("v7" in kind) or ("7x" in kind)


# ----------------------------------------------------------------------------
# Pallas kernels: tiled GEMM with fused per-column scale/shift + ReLU epilogue.
# ----------------------------------------------------------------------------
def _gemm_bn_act_single_kernel(x_ref, w_ref, ss_ref, o_ref, *, act):
    """Single K block: epilogue on the local f32 product, one bf16 store."""
    prod = jnp.dot(x_ref[...], w_ref[...], preferred_element_type=jnp.float32)
    r = prod * ss_ref[0:1, :] + ss_ref[1:2, :]
    if act == "relu":
        r = jnp.maximum(r, 0.0)
    o_ref[...] = r.astype(o_ref.dtype)


def _gemm_bn_act_multi_kernel(x_ref, w_ref, ss_ref, o_ref, acc_ref, *, act):
    """K tiled: accumulate in f32 VMEM scratch, store bf16 once at the last k."""
    k = pl.program_id(2)
    prod = jnp.dot(x_ref[...], w_ref[...], preferred_element_type=jnp.float32)

    @pl.when(k == 0)
    def _():
        acc_ref[...] = prod

    @pl.when(k != 0)
    def _():
        acc_ref[...] = acc_ref[...] + prod

    @pl.when(k == pl.num_programs(2) - 1)
    def _():
        r = acc_ref[...] * ss_ref[0:1, :] + ss_ref[1:2, :]
        if act == "relu":
            r = jnp.maximum(r, 0.0)
        o_ref[...] = r.astype(o_ref.dtype)


@functools.lru_cache(maxsize=None)
def _build_gemm(Mp, Kp, Np, bm, bn, bk, act):
    gm, gn, gk = Mp // bm, Np // bn, Kp // bk

    # Double-buffered bf16 in/out tiles (+ f32 scratch acc when K is tiled) +
    # epilogue vectors, with headroom; capped so it also fits v7x's 64 MiB VMEM.
    vmem_need = (2 * 2 * (bm * bk + bk * bn + bm * bn) + 2 * 2 * bn * 4
                 + (bm * bn * 4 if gk > 1 else 0) + (2 << 20))
    vmem_limit = int(min(max(vmem_need, 32 * 1024 * 1024), 48 * 1024 * 1024))

    cost = pl.CostEstimate(
        flops=2 * Mp * Kp * Np,
        transcendentals=0,
        bytes_accessed=2 * Mp * Kp + 2 * Kp * Np + 2 * Mp * Np + 4 * 2 * Np)

    if gk == 1:
        kernel = partial(_gemm_bn_act_single_kernel, act=act)
        grid = (gm, gn)
        in_specs = [pl.BlockSpec((bm, bk), lambda i, j: (i, 0)),
                    pl.BlockSpec((bk, bn), lambda i, j: (0, j)),
                    pl.BlockSpec((2, bn), lambda i, j: (0, j))]
        out_specs = pl.BlockSpec((bm, bn), lambda i, j: (i, j))
        scratch_shapes = ()
        dims = ("parallel", "parallel")
    else:
        kernel = partial(_gemm_bn_act_multi_kernel, act=act)
        grid = (gm, gn, gk)
        in_specs = [pl.BlockSpec((bm, bk), lambda i, j, k: (i, k)),
                    pl.BlockSpec((bk, bn), lambda i, j, k: (k, j)),
                    pl.BlockSpec((2, bn), lambda i, j, k: (0, j))]
        out_specs = pl.BlockSpec((bm, bn), lambda i, j, k: (i, j))
        scratch_shapes = (pltpu.VMEM((bm, bn), jnp.float32),)
        dims = ("parallel", "parallel", "arbitrary")

    return pl.pallas_call(
        kernel,
        out_shape=jax.ShapeDtypeStruct((Mp, Np), jnp.bfloat16),
        grid_spec=pltpu.PrefetchScalarGridSpec(
            num_scalar_prefetch=0,
            grid=grid,
            in_specs=in_specs,
            out_specs=out_specs,
            scratch_shapes=scratch_shapes),
        compiler_params=pltpu.CompilerParams(
            dimension_semantics=dims,
            vmem_limit_bytes=vmem_limit),
        cost_estimate=cost,
    )


def fused_gemm_scale_shift_act(xm, wm, scale, shift, act="relu"):
    """act((xm @ wm) * scale + shift), scale/shift per output column.

    Operands are bf16 on the MXU; accumulation and epilogue are f32; the stored
    result is bf16.  Returns the padded (Mp, Np) result; the caller slices.
    """
    M, K = xm.shape
    K2, N = wm.shape
    assert K == K2 and K > 0

    multi_tc = _is_multi_tensorcore_chip()

    # --- tile selection -------------------------------------------------------
    Mp = _round_up(M, 128)
    bm_cands = (512, 256, 128) if multi_tc else (1024, 512, 256, 128)
    bm = next(c for c in bm_cands if Mp % c == 0)   # Mp % 128 == 0 -> always hits

    Np = _round_up(N, 128)
    bn = min(512, Np)
    while Np % bn:                                  # Np is a 128 multiple
        bn -= 128

    if K <= 2048:
        # Single K block; pad K to a lane multiple only when nearly free.
        Kp = _round_up(K, 128) if (K % 128 and _round_up(K, 128) <= K + K // 16) else K
        bk = Kp
    else:
        bk = 2048                                   # multiple of 256 (MXU depth)
        Kp = _round_up(K, bk)

    # Only on multi-TensorCore chips (v7x): keep >= 2 parallel (i, j) blocks,
    # preferring to split i (halve bm) so output stores stay lane-dense.
    if multi_tc and (Mp // bm) * (Np // bn) < 2:
        if bm >= 256:
            bm //= 2
        elif bn >= 256:
            bn //= 2

    # --- operand padding / casting --------------------------------------------
    xp = xm if xm.dtype == jnp.bfloat16 else xm.astype(jnp.bfloat16)
    if (Mp, Kp) != (M, K):
        xp = jnp.pad(xp, ((0, Mp - M), (0, Kp - K)))
    wp = wm.astype(jnp.bfloat16)
    if (Kp, Np) != (K, N):
        wp = jnp.pad(wp, ((0, Kp - K), (0, Np - N)))
    ss = jnp.stack([scale.astype(jnp.float32), shift.astype(jnp.float32)])  # (2, N)
    if Np != N:
        ss = jnp.pad(ss, ((0, 0), (0, Np - N)))

    return _build_gemm(Mp, Kp, Np, bm, bn, bk, act)(xp, wp, ss)


# ----------------------------------------------------------------------------
# Conv2d(3x3, stride 1, pad 1) + BatchNorm2d (inference) + ReLU, fused.
# ----------------------------------------------------------------------------
def conv3x3_bn_relu_nhwc(x_nhwc, w_oihw, bias, bn_params):
    """x_nhwc: (B, H, W, Cin); w_oihw: (Cout, Cin, 3, 3) (PyTorch layout). bf16 out."""
    B, H, W, C = x_nhwc.shape
    Cout = w_oihw.shape[0]

    # Spatial zero-pad once; activations travel in bf16 (no-op for layer 2).
    # TODO(synk): layer-1 output could be written straight into a pre-padded (B,H+2,W+2,C) buffer via an offset out index_map to drop this jnp.pad for layer 2.
    xp = jnp.pad(x_nhwc.astype(jnp.bfloat16), ((0, 0), (1, 1), (1, 1), (0, 0)))

    # TODO(synk): the im2col patch matrix is still HBM-materialized (9x activation bytes); the halo-DMA in-kernel conv needs a (band,W,C)->(band*W,C) VMEM reshape that does not lower reliably for C % 128 != 0, so it is deferred.
    taps = [xp[:, dy:dy + H, dx:dx + W, :] for dy in range(3) for dx in range(3)]
    xm = jnp.concatenate(taps, axis=-1).reshape(B * H * W, 9 * C)

    # Weight matrix with K ordered (dy, dx, cin) to match the im2col columns.
    wm = jnp.transpose(w_oihw, (2, 3, 1, 0)).reshape(9 * C, Cout)

    # Fold conv bias + inference BatchNorm into a per-channel scale/shift:
    # relu(gamma/sqrt(var+eps) * (conv + b - mean) + beta)
    gamma, beta, mean, var, eps = bn_params
    s = gamma * jax.lax.rsqrt(var + eps)
    scale = s
    shift = (bias - mean) * s + beta

    out = fused_gemm_scale_shift_act(xm, wm, scale, shift, act="relu")
    return out[:B * H * W, :Cout].reshape(B, H, W, Cout)


def downsample1_forward(params, x_nchw):
    """Downsample1.forward: relu(bn2(conv2(relu(bn1(conv1(x))))))."""
    x = jnp.transpose(x_nchw, (0, 2, 3, 1))                       # NCHW -> NHWC
    x = conv3x3_bn_relu_nhwc(x, params["w1"], params["b1"], params["bn1"])
    x = conv3x3_bn_relu_nhwc(x, params["w2"], params["b2"], params["bn2"])
    return jnp.transpose(x, (0, 3, 1, 2)).astype(jnp.float32)     # NHWC -> NCHW


# ----------------------------------------------------------------------------
# Pure-JAX reference (same semantics as the PyTorch module, f32 everywhere).
# ----------------------------------------------------------------------------
def _conv_bn_relu_ref(x, w, b, bn_params):
    y = jax.lax.conv_general_dilated(
        x, w, window_strides=(1, 1), padding=((1, 1), (1, 1)),
        dimension_numbers=("NCHW", "OIHW", "NCHW"))
    y = y + b[None, :, None, None]
    gamma, beta, mean, var, eps = bn_params
    inv = jax.lax.rsqrt(var + eps)
    y = (y - mean[None, :, None, None]) * (gamma * inv)[None, :, None, None] \
        + beta[None, :, None, None]
    return jnp.maximum(y, 0.0)


def downsample1_reference(params, x):
    x = _conv_bn_relu_ref(x, params["w1"], params["b1"], params["bn1"])
    x = _conv_bn_relu_ref(x, params["w2"], params["b2"], params["bn2"])
    return x


# ----------------------------------------------------------------------------
if __name__ == "__main__":
    B, Cin, Cout, H, W = 2, 4, 32, 16, 16
    ks = jax.random.split(jax.random.PRNGKey(0), 13)

    def bn_init(k1, k2, k3, k4, c):
        return (1.0 + 0.1 * jax.random.normal(k1, (c,), jnp.float32),    # gamma
                0.05 * jax.random.normal(k2, (c,), jnp.float32),         # beta
                0.05 * jax.random.normal(k3, (c,), jnp.float32),         # running mean
                0.5 + jnp.abs(jax.random.normal(k4, (c,), jnp.float32)),  # running var
                1e-5)

    params = {
        "w1": jax.random.normal(ks[0], (Cout, Cin, 3, 3), jnp.float32) * 0.1,
        "b1": jax.random.normal(ks[1], (Cout,), jnp.float32) * 0.05,
        "bn1": bn_init(ks[2], ks[3], ks[4], ks[5], Cout),
        "w2": jax.random.normal(ks[6], (Cout, Cout, 3, 3), jnp.float32) * 0.1,
        "b2": jax.random.normal(ks[7], (Cout,), jnp.float32) * 0.05,
        "bn2": bn_init(ks[8], ks[9], ks[10], ks[11], Cout),
    }
    x = jax.random.normal(ks[12], (B, Cin, H, W), jnp.float32)

    fwd = jax.jit(downsample1_forward)
    y = fwd(params, x)
    jax.block_until_ready(y)

    y_ref = downsample1_reference(params, x)
    assert y.shape == (B, Cout, H, W), y.shape
    assert bool(jnp.all(jnp.isfinite(y)))
    max_ref = float(jnp.max(jnp.abs(y_ref)))
    max_err = float(jnp.max(jnp.abs(y - y_ref)))
    tol = 5e-2 * max(1.0, max_ref)    # scale-aware: bf16 MXU operands + bf16 activations
    assert max_err < tol, f"max abs err {max_err} vs tol {tol}"
    print("KERNEL_OK")
</pallas_src>

<mosaic_0001>
module attributes {stable_mosaic.version = 11 : i64} {
  func.func @_gemm_bn_act_single_kernel(%arg0: i32, %arg1: i32, %arg2: memref<512x36xbf16, #tpu.memory_space<vmem>>, %arg3: memref<36x128xbf16, #tpu.memory_space<vmem>>, %arg4: memref<2x128xf32, #tpu.memory_space<vmem>>, %arg5: memref<512x128xbf16, #tpu.memory_space<vmem>>) attributes {dimension_semantics = [#tpu.dimension_semantics<parallel>, #tpu.dimension_semantics<parallel>], iteration_bounds = array<i64: 1, 1>, scalar_prefetch = 0 : i64, scratch_operands = 0 : i64, tpu.core_type = #tpu.core_type<tc>, window_params = [{transform_indices = @transform_0, window_bounds = array<i64: 512, 36>}, {transform_indices = @transform_1, window_bounds = array<i64: 36, 128>}, {transform_indices = @transform_2, window_bounds = array<i64: 2, 128>}, {transform_indices = @transform_3, window_bounds = array<i64: 512, 128>}]} {
    %c0 = arith.constant 0 : index
    %c0_0 = arith.constant 0 : index
    %0 = vector.load %arg2[%c0, %c0_0] : memref<512x36xbf16, #tpu.memory_space<vmem>>, vector<512x36xbf16>
    %c0_1 = arith.constant 0 : index
    %c0_2 = arith.constant 0 : index
    %1 = vector.load %arg3[%c0_1, %c0_2] : memref<36x128xbf16, #tpu.memory_space<vmem>>, vector<36x128xbf16>
    %cst = arith.constant dense<0.000000e+00> : vector<512x128xf32>
    %2 = tpu.matmul %0, %1, %cst {dimension_numbers = #tpu.dot_dimension_numbers<[1], [0], [0], [1], [0, 0, 1, 1], [], []>} : vector<512x36xbf16>, vector<36x128xbf16>, vector<512x128xf32> -> vector<512x128xf32>
    %c0_3 = arith.constant 0 : index
    %c0_4 = arith.constant 0 : index
    %3 = vector.load %arg4[%c0_3, %c0_4] : memref<2x128xf32, #tpu.memory_space<vmem>>, vector<1x128xf32>
    %4 = vector.broadcast %3 : vector<1x128xf32> to vector<512x128xf32>
    %5 = arith.mulf %2, %4 : vector<512x128xf32>
    %c1 = arith.constant 1 : index
    %c0_5 = arith.constant 0 : index
    %6 = vector.load %arg4[%c1, %c0_5] : memref<2x128xf32, #tpu.memory_space<vmem>>, vector<1x128xf32>
    %7 = vector.broadcast %6 : vector<1x128xf32> to vector<512x128xf32>
    %8 = arith.addf %5, %7 : vector<512x128xf32>
    %cst_6 = arith.constant 0.000000e+00 : f32
    %9 = vector.broadcast %cst_6 : f32 to vector<512x128xf32>
    %10 = arith.maximumf %8, %9 : vector<512x128xf32>
    %11 = arith.truncf %10 : vector<512x128xf32> to vector<512x128xbf16>
    %c0_7 = arith.constant 0 : index
    %c0_8 = arith.constant 0 : index
    %12 = vector.load %arg5[%c0_7, %c0_8] : memref<512x128xbf16, #tpu.memory_space<vmem>>, vector<512x128xbf16>
    tpu.vector_store %arg5[%c0_7, %c0_8], %11 {strides = array<i32>} : memref<512x128xbf16, #tpu.memory_space<vmem>>, vector<512x128xbf16>,
    return
  }
  func.func @transform_0(%arg0: i32, %arg1: i32) -> (i32, i32) {
    %c0_i32 = arith.constant 0 : i32
    %c0_i32_0 = arith.constant 0 : i32
    return %arg0, %c0_i32 : i32, i32
  }
  func.func @transform_1(%arg0: i32, %arg1: i32) -> (i32, i32) {
    %c0_i32 = arith.constant 0 : i32
    %c0_i32_0 = arith.constant 0 : i32
    return %c0_i32, %arg1 : i32, i32
  }
  func.func @transform_2(%arg0: i32, %arg1: i32) -> (i32, i32) {
    %c0_i32 = arith.constant 0 : i32
    %c0_i32_0 = arith.constant 0 : i32
    return %c0_i32, %arg1 : i32, i32
  }
  func.func @transform_3(%arg0: i32, %arg1: i32) -> (i32, i32) {
    %c0_i32 = arith.constant 0 : i32
    return %arg0, %arg1 : i32, i32
  }
}

module attributes {stable_mosaic.version = 11 : i64} {
  func.func @_gemm_bn_act_single_kernel(%arg0: i32, %arg1: i32, %arg2: memref<512x288xbf16, #tpu.memory_space<vmem>>, %arg3: memref<288x128xbf16, #tpu.memory_space<vmem>>, %arg4: memref<2x128xf32, #tpu.memory_space<vmem>>, %arg5: memref<512x128xbf16, #tpu.memory_space<vmem>>) attributes {dimension_semantics = [#tpu.dimension_semantics<parallel>, #tpu.dimension_semantics<parallel>], iteration_bounds = array<i64: 1, 1>, scalar_prefetch = 0 : i64, scratch_operands = 0 : i64, tpu.core_type = #tpu.core_type<tc>, window_params = [{transform_indices = @transform_0, window_bounds = array<i64: 512, 288>}, {transform_indices = @transform_1, window_bounds = array<i64: 288, 128>}, {transform_indices = @transform_2, window_bounds = array<i64: 2, 128>}, {transform_indices = @transform_3, window_bounds = array<i64: 512, 128>}]} {
    %c0 = arith.constant 0 : index
    %c0_0 = arith.constant 0 : index
    %0 = vector.load %arg2[%c0, %c0_0] : memref<512x288xbf16, #tpu.memory_space<vmem>>, vector<512x288xbf16>
    %c0_1 = arith.constant 0 : index
    %c0_2 = arith.constant 0 : index
    %1 = vector.load %arg3[%c0_1, %c0_2] : memref<288x128xbf16, #tpu.memory_space<vmem>>, vector<288x128xbf16>
    %cst = arith.constant dense<0.000000e+00> : vector<512x128xf32>
    %2 = tpu.matmul %0, %1, %cst {dimension_numbers = #tpu.dot_dimension_numbers<[1], [0], [0], [1], [0, 0, 1, 1], [], []>} : vector<512x288xbf16>, vector<288x128xbf16>, vector<512x128xf32> -> vector<512x128xf32>
    %c0_3 = arith.constant 0 : index
    %c0_4 = arith.constant 0 : index
    %3 = vector.load %arg4[%c0_3, %c0_4] : memref<2x128xf32, #tpu.memory_space<vmem>>, vector<1x128xf32>
    %4 = vector.broadcast %3 : vector<1x128xf32> to vector<512x128xf32>
    %5 = arith.mulf %2, %4 : vector<512x128xf32>
    %c1 = arith.constant 1 : index
    %c0_5 = arith.constant 0 : index
    %6 = vector.load %arg4[%c1, %c0_5] : memref<2x128xf32, #tpu.memory_space<vmem>>, vector<1x128xf32>
    %7 = vector.broadcast %6 : vector<1x128xf32> to vector<512x128xf32>
    %8 = arith.addf %5, %7 : vector<512x128xf32>
    %cst_6 = arith.constant 0.000000e+00 : f32
    %9 = vector.broadcast %cst_6 : f32 to vector<512x128xf32>
    %10 = arith.maximumf %8, %9 : vector<512x128xf32>
    %11 = arith.truncf %10 : vector<512x128xf32> to vector<512x128xbf16>
    %c0_7 = arith.constant 0 : index
    %c0_8 = arith.constant 0 : index
    %12 = vector.load %arg5[%c0_7, %c0_8] : memref<512x128xbf16, #tpu.memory_space<vmem>>, vector<512x128xbf16>
    tpu.vector_store %arg5[%c0_7, %c0_8], %11 {strides = array<i32>} : memref<512x128xbf16, #tpu.memory_space<vmem>>, vector<512x128xbf16>,
    return
  }
  func.func @transform_0(%arg0: i32, %arg1: i32) -> (i32, i32) {
    %c0_i32 = arith.constant 0 : i32
    %c0_i32_0 = arith.constant 0 : i32
    return %arg0, %c0_i32 : i32, i32
  }
  func.func @transform_1(%arg0: i32, %arg1: i32) -> (i32, i32) {
    %c0_i32 = arith.constant 0 : i32
    %c0_i32_0 = arith.constant 0 : i32
    return %c0_i32, %arg1 : i32, i32
  }
  func.func @transform_2(%arg0: i32, %arg1: i32) -> (i32, i32) {
    %c0_i32 = arith.constant 0 : i32
    %c0_i32_0 = arith.constant 0 : i32
    return %c0_i32, %arg1 : i32, i32
  }
  func.func @transform_3(%arg0: i32, %arg1: i32) -> (i32, i32) {
    %c0_i32 = arith.constant 0 : i32
    return %arg0, %arg1 : i32, i32
  }
}

</mosaic_0001>

<bundles_post_ra>
// kernel: downsample1_forward.2
= control target key start
LH: loop header
LB: loop body
LE: loop exit
PB: predicated region body
PF: predicated region fallthrough
CT: control target
= control target key end

     0   :  { %vm259_vm0 = vcmask 293888   ;;  %vm356_vm1 = vcmask 1041408   ;;  %s2102_s1 = inlined_call_operand.vmem [shape: bf16[36,128], index: 1, kind: input, shape index: {}]   ;;  %s2103_s0 = inlined_call_operand.vmem [shape: bf16[512,36], index: 0, kind: input, shape index: {}]   ;;  %s2104_s2 = inlined_call_operand.vmem [shape: f32[2,128], index: 2, kind: input, shape index: {}]   ;;  %s2105_s3 = inlined_call_operand.vmem [shape: bf16[512,128], index: 3, kind: output, shape index: {}]  }
   0x1   :  { %v1676_v0 = vld [vmem:[%s2102_s1] sm:$0xff]   ;;  %v1677_v1 = vld [vmem:[%s2102_s1 + $0x8] sm:$0xff]   ;;  %v1678_v2 = vld [vmem:[%s2102_s1 + $0x10] ss:$0 sps:$4 sm:$0x33]  }
   0x2   :  { %1598 = vmatprep.subr.bf16.mxu0 %v1676_v0  ;;  %1668 = vmatprep.subr.bf16.mxu1 %v1676_v0  ;;  %v1679_v3 = vld [vmem:[%s2103_s0] sm:$0xff]   ;;  %v358_v5 = vsel %vm356_vm1, %v1678_v2, 0  ;;  %v1681_v6 = vld [vmem:[%s2103_s0 + $0x8] sm:$0xff]   ;;  %v1683_v8 = vld [vmem:[%s2103_s0 + $0x10] sm:$0xff]  }
   0x3   :  { %1599 = vmatpush3.bf16.msra.mxu0 %v1676_v0  ;;  %1671 = vmatpush3.bf16.msra.mxu1 %v1676_v0  ;;  %v1680_v4 = vld [vmem:[%s2103_s0 + $0x80] sm:$0xff]   ;;  %v1682_v7 = vld [vmem:[%s2103_s0 + $0x88] sm:$0xff]   ;;  %v1684_v9 = vld [vmem:[%s2103_s0 + $0x90] sm:$0xff]  }
   0x4   :  { %1600 = vmatprep.subr.bf16.mxu0 %v1677_v1  ;;  %1669 = vmatprep.subr.bf16.mxu1 %v1677_v1  ;;  %v1685_v10 = vld [vmem:[%s2103_s0 + $0x18] sm:$0xff]   ;;  %v1687_v12 = vld [vmem:[%s2103_s0 + $0x20] sm:$0xff]   ;;  %v1689_v14 = vld [vmem:[%s2103_s0 + $0x28] sm:$0xff]  }
   0x5   :  { %1604 = vmatprep.mubr.msk.bf16.mxu0 %vm259_vm0, %v1679_v3  ;;  %1636 = vmatprep.mubr.msk.bf16.mxu1 %vm259_vm0, %v1680_v4  ;;  %v1686_v11 = vld [vmem:[%s2103_s0 + $0x98] sm:$0xff]   ;;  %v1688_v13 = vld [vmem:[%s2103_s0 + $0xa0] sm:$0xff]   ;;  %v1690_v15 = vld [vmem:[%s2103_s0 + $0xa8] sm:$0xff]  }
   0x6   :  { %v1691_v16 = vld [vmem:[%s2103_s0 + $0x30] sm:$0xff]   ;;  %v1693_v18 = vld [vmem:[%s2103_s0 + $0x38] sm:$0xff]   ;;  %v1695_v20 = vld [vmem:[%s2103_s0 + $0x40] sm:$0xff]  }
   0x7   :  { %1601 = vmatpush3.bf16.msra.mxu0 %v1677_v1  ;;  %1672 = vmatpush3.bf16.msra.mxu1 %v1677_v1  ;;  %v1692_v17 = vld [vmem:[%s2103_s0 + $0xb0] sm:$0xff]   ;;  %v1694_v19 = vld [vmem:[%s2103_s0 + $0xb8] sm:$0xff]   ;;  %v1696_v21 = vld [vmem:[%s2103_s0 + $0xc0] sm:$0xff]  }
   0x8   :  { %1674 = vmatprep.subr.msk.bf16.mxu0 %vm356_vm1, %v1678_v2  ;;  %1675 = vmatprep.subr.msk.bf16.mxu1 %vm356_vm1, %v1678_v2  ;;  %v1697_v22 = vld [vmem:[%s2103_s0 + $0x48] sm:$0xff]   ;;  %v1699_v24 = vld [vmem:[%s2103_s0 + $0x50] sm:$0xff]   ;;  %v1701_v26 = vld [vmem:[%s2103_s0 + $0x58] sm:$0xff]  }
   0x9   :  { %v1698_v23 = vld [vmem:[%s2103_s0 + $0xc8] sm:$0xff]   ;;  %v1700_v25 = vld [vmem:[%s2103_s0 + $0xd0] sm:$0xff]   ;;  %v1702_v27 = vld [vmem:[%s2103_s0 + $0xd8] sm:$0xff]  }
   0xa   :  { %v1703_v28 = vld [vmem:[%s2103_s0 + $0x60] sm:$0xff]   ;;  %v1705_v30 = vld [vmem:[%s2103_s0 + $0x68] sm:$0xff]   ;;  %v1707_v32 = vld [vmem:[%s2103_s0 + $0x70] sm:$0xff]  }
   0xb   :  { %1603 = vmatpush3.bf16.msra.mxu0 %v358_v5  ;;  %1673 = vmatpush3.bf16.msra.mxu1 %v358_v5  ;;  %v1704_v29 = vld [vmem:[%s2103_s0 + $0xe0] sm:$0xff]   ;;  %v1706_v31 = vld [vmem:[%s2103_s0 + $0xe8] sm:$0xff]   ;;  %v1708_v33 = vld [vmem:[%s2103_s0 + $0xf0] sm:$0xff]  }
   0xc   :  { %v1709_v34 = vld [vmem:[%s2103_s0 + $0x78] sm:$0xff]   ;;  %v1871_v36 = vld [vmem:[%s2104_s2] ss:$0 sm:$0xff]  ;;  %v1876_v38 = vld [vmem:[%s2104_s2 + $0x1] ss:$0 sm:$0xff] }
   0xd   :  { %v1710_v35 = vld [vmem:[%s2103_s0 + $0xf8] sm:$0xff]  }
   0xe   :  { %1605 = vmatmul.mubr.msk.bf16.vlgmr.msra.gmra.mrb[0].mxu0 %vm259_vm0, %v1681_v6  ;;  %1637 = vmatmul.mubr.msk.bf16.vlgmr.msra.gmra.mrb[0].mxu1 %vm259_vm0, %v1682_v7 }
   0xf   :  { %1608 = vmatprep.mubr.msk.bf16.mxu0 %vm259_vm0, %v1683_v8  ;;  %1640 = vmatprep.mubr.msk.bf16.mxu1 %vm259_vm0, %v1684_v9 }
  0x16   :  { %1609 = vmatmul.mubr.msk.bf16.gmra.mrb[4].mxu0 %vm259_vm0, %v1685_v10  ;;  %1641 = vmatmul.mubr.msk.bf16.gmra.mrb[4].mxu1 %vm259_vm0, %v1686_v11 }
  0x17   :  { %1612 = vmatprep.mubr.msk.bf16.mxu0 %vm259_vm0, %v1687_v12  ;;  %1644 = vmatprep.mubr.msk.bf16.mxu1 %vm259_vm0, %v1688_v13 }
  0x1e   :  { %1613 = vmatmul.mubr.msk.bf16.gmra.mrb[8].mxu0 %vm259_vm0, %v1689_v14  ;;  %1645 = vmatmul.mubr.msk.bf16.gmra.mrb[8].mxu1 %vm259_vm0, %v1690_v15 }
  0x1f   :  { %1616 = vmatprep.mubr.msk.bf16.mxu0 %vm259_vm0, %v1691_v16  ;;  %1648 = vmatprep.mubr.msk.bf16.mxu1 %vm259_vm0, %v1692_v17 }
  0x26   :  { %1617 = vmatmul.mubr.msk.bf16.gmra.mrb[12].mxu0 %vm259_vm0, %v1693_v18  ;;  %1649 = vmatmul.mubr.msk.bf16.gmra.mrb[12].mxu1 %vm259_vm0, %v1694_v19 }
  0x27   :  { %1620 = vmatprep.mubr.msk.bf16.mxu0 %vm259_vm0, %v1695_v20  ;;  %1652 = vmatprep.mubr.msk.bf16.mxu1 %vm259_vm0, %v1696_v21 }
  0x2e   :  { %1621 = vmatmul.mubr.msk.bf16.gmra.mrb[16].mxu0 %vm259_vm0, %v1697_v22  ;;  %1653 = vmatmul.mubr.msk.bf16.gmra.mrb[16].mxu1 %vm259_vm0, %v1698_v23 }
  0x2f   :  { %1624 = vmatprep.mubr.msk.bf16.mxu0 %vm259_vm0, %v1699_v24  ;;  %1656 = vmatprep.mubr.msk.bf16.mxu1 %vm259_vm0, %v1700_v25 }
  0x36   :  { %1625 = vmatmul.mubr.msk.bf16.gmra.mrb[20].mxu0 %vm259_vm0, %v1701_v26  ;;  %1657 = vmatmul.mubr.msk.bf16.gmra.mrb[20].mxu1 %vm259_vm0, %v1702_v27 }
  0x37   :  { %1628 = vmatprep.mubr.msk.bf16.mxu0 %vm259_vm0, %v1703_v28  ;;  %1660 = vmatprep.mubr.msk.bf16.mxu1 %vm259_vm0, %v1704_v29 }
  0x3e   :  { %1629 = vmatmul.mubr.msk.bf16.gmra.mrb[24].mxu0 %vm259_vm0, %v1705_v30  ;;  %1661 = vmatmul.mubr.msk.bf16.gmra.mrb[24].mxu1 %vm259_vm0, %v1706_v31 }
  0x3f   :  { %1632 = vmatprep.mubr.msk.bf16.mxu0 %vm259_vm0, %v1707_v32  ;;  %1664 = vmatprep.mubr.msk.bf16.mxu1 %vm259_vm0, %v1708_v33 }
  0x46   :  { %1633 = vmatmul.mubr.msk.bf16.gmra.mrb[28].mxu0 %vm259_vm0, %v1709_v34  ;;  %1665 = vmatmul.mubr.msk.bf16.gmra.mrb[28].mxu1 %vm259_vm0, %v1710_v35 }
  0xe1   :  { %v1606_v37 = vpop.f32.mrb[0].mxu0  ;;  %v1638_v39 = vpop.f32.mrb[0].mxu1 }
  0xe2   :  { %v656_v40 = vmul.f32 %v1606_v37, %v1871_v36  ;;  %v688_v41 = vmul.f32 %v1638_v39, %v1871_v36  ;;  %v394_v42 = vpop.f32.mrb[1].mxu0  ;;  %v522_v43 = vpop.f32.mrb[1].mxu1 }
  0xe3   :  { %v654_v44 = vmul.f32 %v1871_v36, %v394_v42  ;;  %v686_v45 = vmul.f32 %v1871_v36, %v522_v43  ;;  %v1607_v46 = vpop.f32.mrb[2].mxu0  ;;  %v1639_v47 = vpop.f32.mrb[2].mxu1 }
  0xe4   :  { %v725_v48 = vadd.f32 %v1876_v38, %v656_v40  ;;  %v757_v49 = vadd.f32 %v1876_v38, %v688_v41  ;;  %v657_v50 = vmul.f32 %v1607_v46, %v1871_v36  ;;  %v689_v51 = vmul.f32 %v1639_v47, %v1871_v36  ;;  %v397_v52 = vpop.f32.mrb[3].mxu0  ;;  %v525_v53 = vpop.f32.mrb[3].mxu1 }
  0xe5   :  { %v723_v54 = vadd.f32 %v1876_v38, %v654_v44  ;;  %v755_v55 = vadd.f32 %v1876_v38, %v686_v45  ;;  %v655_v56 = vmul.f32 %v1871_v36, %v397_v52  ;;  %v687_v57 = vmul.f32 %v1871_v36, %v525_v53 }
  0xe6   :  { %v726_v58 = vadd.f32 %v1876_v38, %v657_v50  ;;  %v758_v59 = vadd.f32 %v1876_v38, %v689_v51  ;;  %v789_v62 = vmax.f32 %v725_v48, 0.0  ;;  %v821_v63 = vmax.f32 %v757_v49, 0.0 }
  0xe7   :  { %v724_v60 = vadd.f32 %v1876_v38, %v655_v56  ;;  %v756_v61 = vadd.f32 %v1876_v38, %v687_v57  ;;  %v787_v2 = vmax.f32 %v723_v54, 0.0  ;;  %v819_v3 = vmax.f32 %v755_v55, 0.0 }
  0xe8   :  { %v790_v0 = vmax.f32 %v726_v58, 0.0  ;;  %v822_v1 = vmax.f32 %v758_v59, 0.0 }
  0xe9   :  { %v788_v4 = vmax.f32 %v724_v60, 0.0  ;;  %v820_v5 = vmax.f32 %v756_v61, 0.0  ;;  %v1610_v6 = vpop.f32.mrb[4].mxu0  ;;  %v1642_v7 = vpop.f32.mrb[4].mxu1 }
  0xea   :  { %v1380_v8 = vpack.c.bf16 %v790_v0, %v789_v62  ;;  %v1460_v9 = vpack.c.bf16 %v822_v1, %v821_v63  ;;  %v660_v10 = vmul.f32 %v1610_v6, %v1871_v36  ;;  %v692_v11 = vmul.f32 %v1642_v7, %v1871_v36  ;;  %v410_v12 = vpop.f32.mrb[5].mxu0  ;;  %v538_v13 = vpop.f32.mrb[5].mxu1 }
  0xeb   :  { %v1375_v14 = vpack.c.bf16 %v788_v4, %v787_v2  ;;  %v1455_v15 = vpack.c.bf16 %v820_v5, %v819_v3  ;;  %v658_v16 = vmul.f32 %v1871_v36, %v410_v12  ;;  %v690_v17 = vmul.f32 %v1871_v36, %v538_v13  ;;  %v1611_v18 = vpop.f32.mrb[6].mxu0  ;;  %v1643_v19 = vpop.f32.mrb[6].mxu1 }
  0xec   :  { %1532 = vst [vmem:[%s2105_s3 + $0x8] sm:$0xff] %v1380_v8   ;;  %1548 = vst [vmem:[%s2105_s3 + $0x88] sm:$0xff] %v1460_v9   ;;  %v729_v20 = vadd.f32 %v1876_v38, %v660_v10  ;;  %v761_v21 = vadd.f32 %v1876_v38, %v692_v11  ;;  %v661_v22 = vmul.f32 %v1611_v18, %v1871_v36  ;;  %v413_v24 = vpop.f32.mrb[7].mxu0  ;;  %v541_v25 = vpop.f32.mrb[7].mxu1 }
  0xed   :  { %v693_v23 = vmul.f32 %v1643_v19, %v1871_v36  ;;  %1376 = vst [vmem:[%s2105_s3] sm:$0xff] %v1375_v14   ;;  %1547 = vst [vmem:[%s2105_s3 + $0x80] sm:$0xff] %v1455_v15   ;;  %v727_v26 = vadd.f32 %v1876_v38, %v658_v16  ;;  %v759_v27 = vadd.f32 %v1876_v38, %v690_v17 }
  0xee   :  { %v659_v28 = vmul.f32 %v1871_v36, %v413_v24  ;;  %v691_v29 = vmul.f32 %v1871_v36, %v541_v25  ;;  %v730_v30 = vadd.f32 %v1876_v38, %v661_v22  ;;  %v793_v34 = vmax.f32 %v729_v20, 0.0 }
  0xef   :  { %v762_v31 = vadd.f32 %v1876_v38, %v693_v23  ;;  %v825_v35 = vmax.f32 %v761_v21, 0.0  ;;  %v791_v40 = vmax.f32 %v727_v26, 0.0  ;;  %v823_v41 = vmax.f32 %v759_v27, 0.0 }
  0xf0   :  { %v728_v32 = vadd.f32 %v1876_v38, %v659_v28  ;;  %v760_v33 = vadd.f32 %v1876_v38, %v691_v29  ;;  %v794_v37 = vmax.f32 %v730_v30, 0.0 }
  0xf1   :  { %v826_v39 = vmax.f32 %v762_v31, 0.0  ;;  %v1614_v44 = vpop.f32.mrb[8].mxu0  ;;  %v1646_v45 = vpop.f32.mrb[8].mxu1 }
  0xf2   :  { %v792_v42 = vmax.f32 %v728_v32, 0.0  ;;  %v824_v43 = vmax.f32 %v760_v33, 0.0  ;;  %v1390_v46 = vpack.c.bf16 %v794_v37, %v793_v34  ;;  %v664_v48 = vmul.f32 %v1614_v44, %v1871_v36  ;;  %v426_v50 = vpop.f32.mrb[9].mxu0  ;;  %v554_v51 = vpop.f32.mrb[9].mxu1 }
  0xf3   :  { %v1470_v47 = vpack.c.bf16 %v826_v39, %v825_v35  ;;  %v696_v49 = vmul.f32 %v1646_v45, %v1871_v36  ;;  %v662_v54 = vmul.f32 %v1871_v36, %v426_v50  ;;  %v694_v55 = vmul.f32 %v1871_v36, %v554_v51  ;;  %v1615_v56 = vpop.f32.mrb[10].mxu0  ;;  %v1647_v57 = vpop.f32.mrb[10].mxu1 }
  0xf4   :  { %v1385_v52 = vpack.c.bf16 %v792_v42, %v791_v40  ;;  %v1465_v53 = vpack.c.bf16 %v824_v43, %v823_v41  ;;  %1534 = vst [vmem:[%s2105_s3 + $0x18] sm:$0xff] %v1390_v46   ;;  %v733_v58 = vadd.f32 %v1876_v38, %v664_v48  ;;  %v665_v60 = vmul.f32 %v1615_v56, %v1871_v36  ;;  %v429_v62 = vpop.f32.mrb[11].mxu0  ;;  %v557_v63 = vpop.f32.mrb[11].mxu1 }
  0xf5   :  { %1550 = vst [vmem:[%s2105_s3 + $0x98] sm:$0xff] %v1470_v47   ;;  %v765_v59 = vadd.f32 %v1876_v38, %v696_v49  ;;  %v697_v61 = vmul.f32 %v1647_v57, %v1871_v36  ;;  %v731_v0 = vadd.f32 %v1876_v38, %v662_v54  ;;  %v763_v1 = vadd.f32 %v1876_v38, %v694_v55 }
  0xf6   :  { %1533 = vst [vmem:[%s2105_s3 + $0x10] sm:$0xff] %v1385_v52   ;;  %1549 = vst [vmem:[%s2105_s3 + $0x90] sm:$0xff] %v1465_v53   ;;  %v663_v2 = vmul.f32 %v1871_v36, %v429_v62  ;;  %v695_v3 = vmul.f32 %v1871_v36, %v557_v63  ;;  %v734_v4 = vadd.f32 %v1876_v38, %v665_v60  ;;  %v797_v8 = vmax.f32 %v733_v58, 0.0 }
  0xf7   :  { %v766_v5 = vadd.f32 %v1876_v38, %v697_v61  ;;  %v829_v9 = vmax.f32 %v765_v59, 0.0  ;;  %v795_v12 = vmax.f32 %v731_v0, 0.0  ;;  %v827_v13 = vmax.f32 %v763_v1, 0.0 }
  0xf8   :  { %v732_v6 = vadd.f32 %v1876_v38, %v663_v2  ;;  %v764_v7 = vadd.f32 %v1876_v38, %v695_v3  ;;  %v798_v10 = vmax.f32 %v734_v4, 0.0 }
  0xf9   :  { %v830_v11 = vmax.f32 %v766_v5, 0.0  ;;  %v1618_v16 = vpop.f32.mrb[12].mxu0  ;;  %v1650_v17 = vpop.f32.mrb[12].mxu1 }
  0xfa   :  { %v796_v14 = vmax.f32 %v732_v6, 0.0  ;;  %v828_v15 = vmax.f32 %v764_v7, 0.0  ;;  %v1400_v18 = vpack.c.bf16 %v798_v10, %v797_v8  ;;  %v668_v20 = vmul.f32 %v1618_v16, %v1871_v36  ;;  %v442_v22 = vpop.f32.mrb[13].mxu0  ;;  %v570_v23 = vpop.f32.mrb[13].mxu1 }
  0xfb   :  { %v1480_v19 = vpack.c.bf16 %v830_v11, %v829_v9  ;;  %v700_v21 = vmul.f32 %v1650_v17, %v1871_v36  ;;  %v666_v26 = vmul.f32 %v1871_v36, %v442_v22  ;;  %v698_v27 = vmul.f32 %v1871_v36, %v570_v23  ;;  %v1619_v28 = vpop.f32.mrb[14].mxu0  ;;  %v1651_v29 = vpop.f32.mrb[14].mxu1 }
  0xfc   :  { %v1395_v24 = vpack.c.bf16 %v796_v14, %v795_v12  ;;  %v1475_v25 = vpack.c.bf16 %v828_v15, %v827_v13  ;;  %1536 = vst [vmem:[%s2105_s3 + $0x28] sm:$0xff] %v1400_v18   ;;  %v737_v30 = vadd.f32 %v1876_v38, %v668_v20  ;;  %v669_v32 = vmul.f32 %v1619_v28, %v1871_v36  ;;  %v445_v34 = vpop.f32.mrb[15].mxu0  ;;  %v573_v35 = vpop.f32.mrb[15].mxu1 }
  0xfd   :  { %1552 = vst [vmem:[%s2105_s3 + $0xa8] sm:$0xff] %v1480_v19   ;;  %v769_v31 = vadd.f32 %v1876_v38, %v700_v21  ;;  %v701_v33 = vmul.f32 %v1651_v29, %v1871_v36  ;;  %v735_v37 = vadd.f32 %v1876_v38, %v666_v26  ;;  %v767_v39 = vadd.f32 %v1876_v38, %v698_v27 }
  0xfe   :  { %1535 = vst [vmem:[%s2105_s3 + $0x20] sm:$0xff] %v1395_v24   ;;  %1551 = vst [vmem:[%s2105_s3 + $0xa0] sm:$0xff] %v1475_v25   ;;  %v667_v40 = vmul.f32 %v1871_v36, %v445_v34  ;;  %v699_v41 = vmul.f32 %v1871_v36, %v573_v35  ;;  %v738_v42 = vadd.f32 %v1876_v38, %v669_v32  ;;  %v801_v46 = vmax.f32 %v737_v30, 0.0 }
  0xff   :  { %v770_v43 = vadd.f32 %v1876_v38, %v701_v33  ;;  %v833_v47 = vmax.f32 %v769_v31, 0.0  ;;  %v799_v50 = vmax.f32 %v735_v37, 0.0  ;;  %v831_v51 = vmax.f32 %v767_v39, 0.0 }
 0x100   :  { %v736_v44 = vadd.f32 %v1876_v38, %v667_v40  ;;  %v768_v45 = vadd.f32 %v1876_v38, %v699_v41  ;;  %v802_v48 = vmax.f32 %v738_v42, 0.0 }
 0x101   :  { %v834_v49 = vmax.f32 %v770_v43, 0.0  ;;  %v1622_v54 = vpop.f32.mrb[16].mxu0  ;;  %v1654_v55 = vpop.f32.mrb[16].mxu1 }
 0x102   :  { %v800_v52 = vmax.f32 %v736_v44, 0.0  ;;  %v832_v53 = vmax.f32 %v768_v45, 0.0  ;;  %v1410_v56 = vpack.c.bf16 %v802_v48, %v801_v46  ;;  %v672_v58 = vmul.f32 %v1622_v54, %v1871_v36  ;;  %v458_v60 = vpop.f32.mrb[17].mxu0  ;;  %v586_v61 = vpop.f32.mrb[17].mxu1 }
 0x103   :  { %v1490_v57 = vpack.c.bf16 %v834_v49, %v833_v47  ;;  %v704_v59 = vmul.f32 %v1654_v55, %v1871_v36  ;;  %v670_v0 = vmul.f32 %v1871_v36, %v458_v60  ;;  %v702_v1 = vmul.f32 %v1871_v36, %v586_v61  ;;  %v1623_v2 = vpop.f32.mrb[18].mxu0  ;;  %v1655_v3 = vpop.f32.mrb[18].mxu1 }
 0x104   :  { %v1405_v62 = vpack.c.bf16 %v800_v52, %v799_v50  ;;  %v1485_v63 = vpack.c.bf16 %v832_v53, %v831_v51  ;;  %1538 = vst [vmem:[%s2105_s3 + $0x38] sm:$0xff] %v1410_v56   ;;  %v741_v4 = vadd.f32 %v1876_v38, %v672_v58  ;;  %v673_v6 = vmul.f32 %v1623_v2, %v1871_v36  ;;  %v461_v8 = vpop.f32.mrb[19].mxu0  ;;  %v589_v9 = vpop.f32.mrb[19].mxu1 }
 0x105   :  { %1554 = vst [vmem:[%s2105_s3 + $0xb8] sm:$0xff] %v1490_v57   ;;  %v773_v5 = vadd.f32 %v1876_v38, %v704_v59  ;;  %v705_v7 = vmul.f32 %v1655_v3, %v1871_v36  ;;  %v739_v10 = vadd.f32 %v1876_v38, %v670_v0  ;;  %v771_v11 = vadd.f32 %v1876_v38, %v702_v1 }
 0x106   :  { %1537 = vst [vmem:[%s2105_s3 + $0x30] sm:$0xff] %v1405_v62   ;;  %1553 = vst [vmem:[%s2105_s3 + $0xb0] sm:$0xff] %v1485_v63   ;;  %v671_v12 = vmul.f32 %v1871_v36, %v461_v8  ;;  %v703_v13 = vmul.f32 %v1871_v36, %v589_v9  ;;  %v742_v14 = vadd.f32 %v1876_v38, %v673_v6  ;;  %v805_v18 = vmax.f32 %v741_v4, 0.0 }
 0x107   :  { %v774_v15 = vadd.f32 %v1876_v38, %v705_v7  ;;  %v837_v19 = vmax.f32 %v773_v5, 0.0  ;;  %v803_v22 = vmax.f32 %v739_v10, 0.0  ;;  %v835_v23 = vmax.f32 %v771_v11, 0.0 }
 0x108   :  { %v740_v16 = vadd.f32 %v1876_v38, %v671_v12  ;;  %v772_v17 = vadd.f32 %v1876_v38, %v703_v13  ;;  %v806_v20 = vmax.f32 %v742_v14, 0.0 }
 0x109   :  { %v838_v21 = vmax.f32 %v774_v15, 0.0  ;;  %v1626_v26 = vpop.f32.mrb[20].mxu0  ;;  %v1658_v27 = vpop.f32.mrb[20].mxu1 }
 0x10a   :  { %v804_v24 = vmax.f32 %v740_v16, 0.0  ;;  %v836_v25 = vmax.f32 %v772_v17, 0.0  ;;  %v1420_v28 = vpack.c.bf16 %v806_v20, %v805_v18  ;;  %v676_v30 = vmul.f32 %v1626_v26, %v1871_v36  ;;  %v474_v32 = vpop.f32.mrb[21].mxu0  ;;  %v602_v33 = vpop.f32.mrb[21].mxu1 }
 0x10b   :  { %v1500_v29 = vpack.c.bf16 %v838_v21, %v837_v19  ;;  %v708_v31 = vmul.f32 %v1658_v27, %v1871_v36  ;;  %v674_v37 = vmul.f32 %v1871_v36, %v474_v32  ;;  %v706_v39 = vmul.f32 %v1871_v36, %v602_v33  ;;  %v1627_v40 = vpop.f32.mrb[22].mxu0  ;;  %v1659_v41 = vpop.f32.mrb[22].mxu1 }
 0x10c   :  { %v1415_v34 = vpack.c.bf16 %v804_v24, %v803_v22  ;;  %v1495_v35 = vpack.c.bf16 %v836_v25, %v835_v23  ;;  %1540 = vst [vmem:[%s2105_s3 + $0x48] sm:$0xff] %v1420_v28   ;;  %v745_v42 = vadd.f32 %v1876_v38, %v676_v30  ;;  %v677_v44 = vmul.f32 %v1627_v40, %v1871_v36  ;;  %v477_v46 = vpop.f32.mrb[23].mxu0  ;;  %v605_v47 = vpop.f32.mrb[23].mxu1 }
 0x10d   :  { %1556 = vst [vmem:[%s2105_s3 + $0xc8] sm:$0xff] %v1500_v29   ;;  %v777_v43 = vadd.f32 %v1876_v38, %v708_v31  ;;  %v709_v45 = vmul.f32 %v1659_v41, %v1871_v36  ;;  %v743_v48 = vadd.f32 %v1876_v38, %v674_v37  ;;  %v775_v49 = vadd.f32 %v1876_v38, %v706_v39 }
 0x10e   :  { %1539 = vst [vmem:[%s2105_s3 + $0x40] sm:$0xff] %v1415_v34   ;;  %1555 = vst [vmem:[%s2105_s3 + $0xc0] sm:$0xff] %v1495_v35   ;;  %v675_v50 = vmul.f32 %v1871_v36, %v477_v46  ;;  %v707_v51 = vmul.f32 %v1871_v36, %v605_v47  ;;  %v746_v52 = vadd.f32 %v1876_v38, %v677_v44  ;;  %v809_v56 = vmax.f32 %v745_v42, 0.0 }
 0x10f   :  { %v778_v53 = vadd.f32 %v1876_v38, %v709_v45  ;;  %v841_v57 = vmax.f32 %v777_v43, 0.0  ;;  %v807_v60 = vmax.f32 %v743_v48, 0.0  ;;  %v839_v61 = vmax.f32 %v775_v49, 0.0 }
 0x110   :  { %v744_v54 = vadd.f32 %v1876_v38, %v675_v50  ;;  %v776_v55 = vadd.f32 %v1876_v38, %v707_v51  ;;  %v810_v58 = vmax.f32 %v746_v52, 0.0 }
 0x111   :  { %v842_v59 = vmax.f32 %v778_v53, 0.0  ;;  %v1630_v0 = vpop.f32.mrb[24].mxu0  ;;  %v1662_v1 = vpop.f32.mrb[24].mxu1 }
 0x112   :  { %v808_v62 = vmax.f32 %v744_v54, 0.0  ;;  %v840_v63 = vmax.f32 %v776_v55, 0.0  ;;  %v1430_v2 = vpack.c.bf16 %v810_v58, %v809_v56  ;;  %v680_v4 = vmul.f32 %v1630_v0, %v1871_v36  ;;  %v490_v6 = vpop.f32.mrb[25].mxu0  ;;  %v618_v7 = vpop.f32.mrb[25].mxu1 }
 0x113   :  { %v1510_v3 = vpack.c.bf16 %v842_v59, %v841_v57  ;;  %v712_v5 = vmul.f32 %v1662_v1, %v1871_v36  ;;  %v678_v10 = vmul.f32 %v1871_v36, %v490_v6  ;;  %v710_v11 = vmul.f32 %v1871_v36, %v618_v7  ;;  %v1631_v12 = vpop.f32.mrb[26].mxu0  ;;  %v1663_v13 = vpop.f32.mrb[26].mxu1 }
 0x114   :  { %v1425_v8 = vpack.c.bf16 %v808_v62, %v807_v60  ;;  %v1505_v9 = vpack.c.bf16 %v840_v63, %v839_v61  ;;  %1542 = vst [vmem:[%s2105_s3 + $0x58] sm:$0xff] %v1430_v2   ;;  %v749_v14 = vadd.f32 %v1876_v38, %v680_v4  ;;  %v681_v16 = vmul.f32 %v1631_v12, %v1871_v36  ;;  %v493_v18 = vpop.f32.mrb[27].mxu0  ;;  %v621_v19 = vpop.f32.mrb[27].mxu1 }
 0x115   :  { %1558 = vst [vmem:[%s2105_s3 + $0xd8] sm:$0xff] %v1510_v3   ;;  %v781_v15 = vadd.f32 %v1876_v38, %v712_v5  ;;  %v713_v17 = vmul.f32 %v1663_v13, %v1871_v36  ;;  %v747_v20 = vadd.f32 %v1876_v38, %v678_v10  ;;  %v779_v21 = vadd.f32 %v1876_v38, %v710_v11 }
 0x116   :  { %1541 = vst [vmem:[%s2105_s3 + $0x50] sm:$0xff] %v1425_v8   ;;  %1557 = vst [vmem:[%s2105_s3 + $0xd0] sm:$0xff] %v1505_v9   ;;  %v679_v22 = vmul.f32 %v1871_v36, %v493_v18  ;;  %v711_v23 = vmul.f32 %v1871_v36, %v621_v19  ;;  %v750_v24 = vadd.f32 %v1876_v38, %v681_v16  ;;  %v813_v28 = vmax.f32 %v749_v14, 0.0 }
 0x117   :  { %v782_v25 = vadd.f32 %v1876_v38, %v713_v17  ;;  %v845_v29 = vmax.f32 %v781_v15, 0.0  ;;  %v811_v32 = vmax.f32 %v747_v20, 0.0  ;;  %v843_v33 = vmax.f32 %v779_v21, 0.0 }
 0x118   :  { %v748_v26 = vadd.f32 %v1876_v38, %v679_v22  ;;  %v780_v27 = vadd.f32 %v1876_v38, %v711_v23  ;;  %v814_v30 = vmax.f32 %v750_v24, 0.0 }
 0x119   :  { %v846_v31 = vmax.f32 %v782_v25, 0.0  ;;  %v1634_v37 = vpop.f32.mrb[28].mxu0  ;;  %v1666_v39 = vpop.f32.mrb[28].mxu1 }
 0x11a   :  { %v812_v34 = vmax.f32 %v748_v26, 0.0  ;;  %v844_v35 = vmax.f32 %v780_v27, 0.0  ;;  %v1440_v40 = vpack.c.bf16 %v814_v30, %v813_v28  ;;  %v684_v42 = vmul.f32 %v1634_v37, %v1871_v36  ;;  %v506_v44 = vpop.f32.mrb[29].mxu0  ;;  %v634_v45 = vpop.f32.mrb[29].mxu1 }
 0x11b   :  { %v1520_v41 = vpack.c.bf16 %v846_v31, %v845_v29  ;;  %v716_v43 = vmul.f32 %v1666_v39, %v1871_v36  ;;  %v682_v48 = vmul.f32 %v1871_v36, %v506_v44  ;;  %v714_v49 = vmul.f32 %v1871_v36, %v634_v45  ;;  %v1635_v50 = vpop.f32.mrb[30].mxu0  ;;  %v1667_v51 = vpop.f32.mrb[30].mxu1 }
 0x11c   :  { %v1435_v46 = vpack.c.bf16 %v812_v34, %v811_v32  ;;  %v1515_v47 = vpack.c.bf16 %v844_v35, %v843_v33  ;;  %1544 = vst [vmem:[%s2105_s3 + $0x68] sm:$0xff] %v1440_v40   ;;  %v753_v52 = vadd.f32 %v1876_v38, %v684_v42  ;;  %v685_v54 = vmul.f32 %v1635_v50, %v1871_v36  ;;  %v509_v56 = vpop.f32.mrb[31].mxu0  ;;  %v637_v57 = vpop.f32.mrb[31].mxu1 }
 0x11d   :  { %1560 = vst [vmem:[%s2105_s3 + $0xe8] sm:$0xff] %v1520_v41   ;;  %v785_v53 = vadd.f32 %v1876_v38, %v716_v43  ;;  %v717_v55 = vmul.f32 %v1667_v51, %v1871_v36  ;;  %v751_v58 = vadd.f32 %v1876_v38, %v682_v48  ;;  %v783_v59 = vadd.f32 %v1876_v38, %v714_v49 }
 0x11e   :  { %1543 = vst [vmem:[%s2105_s3 + $0x60] sm:$0xff] %v1435_v46   ;;  %1559 = vst [vmem:[%s2105_s3 + $0xe0] sm:$0xff] %v1515_v47   ;;  %v683_v60 = vmul.f32 %v1871_v36, %v509_v56  ;;  %v715_v61 = vmul.f32 %v1871_v36, %v637_v57  ;;  %v754_v62 = vadd.f32 %v1876_v38, %v685_v54  ;;  %v817_v2 = vmax.f32 %v753_v52, 0.0 }
 0x11f   :  { %v786_v63 = vadd.f32 %v1876_v38, %v717_v55  ;;  %v849_v3 = vmax.f32 %v785_v53, 0.0  ;;  %v815_v6 = vmax.f32 %v751_v58, 0.0  ;;  %v847_v7 = vmax.f32 %v783_v59, 0.0 }
 0x120   :  { %v752_v0 = vadd.f32 %v1876_v38, %v683_v60  ;;  %v784_v1 = vadd.f32 %v1876_v38, %v715_v61  ;;  %v818_v4 = vmax.f32 %v754_v62, 0.0 }
 0x121   :  { %v850_v5 = vmax.f32 %v786_v63, 0.0 }
 0x122   :  { %v816_v8 = vmax.f32 %v752_v0, 0.0  ;;  %v848_v9 = vmax.f32 %v784_v1, 0.0  ;;  %v1450_v10 = vpack.c.bf16 %v818_v4, %v817_v2 }
 0x123   :  { %v1530_v11 = vpack.c.bf16 %v850_v5, %v849_v3 }
 0x124   :  { %v1445_v12 = vpack.c.bf16 %v816_v8, %v815_v6  ;;  %v1525_v36 = vpack.c.bf16 %v848_v9, %v847_v7  ;;  %1546 = vst [vmem:[%s2105_s3 + $0x78] sm:$0xff] %v1450_v10  }
 0x125   :  { %1562 = vst [vmem:[%s2105_s3 + $0xf8] sm:$0xff] %v1530_v11  }
 0x126   :  { %1545 = vst [vmem:[%s2105_s3 + $0x70] sm:$0xff] %v1445_v12   ;;  %1561 = vst [vmem:[%s2105_s3 + $0xf0] sm:$0xff] %v1525_v36  }

// kernel: downsample1_forward.3
= control target key start
LH: loop header
LB: loop body
LE: loop exit
PB: predicated region body
PF: predicated region fallthrough
CT: control target
= control target key end

     0   :  { %v2716_v0 = vmov 0   ;;  %vm767_vm0 = vcmask 261120   ;;  %s3512_s1 = inlined_call_operand.vmem [shape: bf16[288,128], index: 1, kind: input, shape index: {}]   ;;  %s3513_s0 = inlined_call_operand.vmem [shape: bf16[512,288], index: 0, kind: input, shape index: {}]   ;;  %s3514_s2 = inlined_call_operand.vmem [shape: f32[2,128], index: 2, kind: input, shape index: {}]   ;;  %s3515_s3 = inlined_call_operand.vmem [shape: bf16[512,128], index: 3, kind: output, shape index: {}]  }
   0x1   :  { %864 = vmatprep.subr.bf16.mxu0 %v2716_v0  ;;  %2537 = vmatprep.subr.bf16.mxu1 %v2716_v0  ;;  %v2570_v1 = vld [vmem:[%s3512_s1] sm:$0xff]   ;;  %v2571_v2 = vld [vmem:[%s3512_s1 + $0x8] sm:$0xff]   ;;  %v2572_v3 = vld [vmem:[%s3512_s1 + $0x10] sm:$0xff]  }
   0x2   :  { %865 = vmatpush1.bf16.msra.mxu0 %v2570_v1  ;;  %2553 = vmatpush1.bf16.msra.mxu1 %v2570_v1  ;;  %v2573_v4 = vld [vmem:[%s3512_s1 + $0x18] sm:$0xff]   ;;  %v2574_v5 = vld [vmem:[%s3512_s1 + $0x20] sm:$0xff]   ;;  %v2575_v7 = vld [vmem:[%s3512_s1 + $0x28] sm:$0xff]  }
   0x3   :  { %866 = vmatprep.subr.bf16.mxu0 %v2716_v0  ;;  %2538 = vmatprep.subr.bf16.mxu1 %v2716_v0  ;;  %v2588_v6 = vld [vmem:[%s3513_s0 + $0x4] ss:$12 sps:$4 sm:$0xff]   ;;  %v2577_v10 = vld [vmem:[%s3512_s1 + $0x38] sm:$0xff]   ;;  %v2579_v12 = vld [vmem:[%s3512_s1 + $0x48] sm:$0xff]  }
   0x4   :  { %v2591_v8 = vld [vmem:[%s3513_s0 + $0x244] ss:$12 sps:$4 sm:$0xff]   ;;  %896 = vmatprep.mubr.bf16.mxu0 %v2588_v6  ;;  %v2581_v14 = vld [vmem:[%s3512_s1 + $0x58] sm:$0xff]   ;;  %v2583_v16 = vld [vmem:[%s3512_s1 + $0x68] sm:$0xff]  }
   0x5   :  { %1088 = vmatprep.mubr.bf16.mxu1 %v2591_v8  ;;  %v2576_v9 = vld [vmem:[%s3512_s1 + $0x30] sm:$0xff]   ;;  %v2578_v11 = vld [vmem:[%s3512_s1 + $0x40] sm:$0xff]   ;;  %v2585_v18 = vld [vmem:[%s3512_s1 + $0x78] sm:$0xff]  }
   0x6   :  { %867 = vmatpush1.bf16.msra.mxu0 %v2571_v2  ;;  %2554 = vmatpush1.bf16.msra.mxu1 %v2571_v2  ;;  %v2580_v13 = vld [vmem:[%s3512_s1 + $0x50] sm:$0xff]   ;;  %v2582_v15 = vld [vmem:[%s3512_s1 + $0x60] sm:$0xff]   ;;  %v2593_v22 = vld [vmem:[%s3513_s0 + $0x1c] ss:$12 sps:$4 sm:$0xff]  }
   0x7   :  { %868 = vmatprep.subr.bf16.mxu0 %v2716_v0  ;;  %2539 = vmatprep.subr.bf16.mxu1 %v2716_v0  ;;  %v2584_v17 = vld [vmem:[%s3512_s1 + $0x70] sm:$0xff]   ;;  %v2592_v19 = vld [vmem:[%s3512_s1 + $0x80] sm:$0xff]   ;;  %v2595_v23 = vld [vmem:[%s3513_s0 + $0x25c] ss:$12 sps:$4 sm:$0xff]  }
   0x8   :  { %v2586_v20 = vld [vmem:[%s3513_s0] ss:$12 sps:$4 sm:$0xff]   ;;  %v2597_v25 = vld [vmem:[%s3513_s0 + $0x18] ss:$12 sps:$4 sm:$0xff]   ;;  %v2603_v29 = vld [vmem:[%s3513_s0 + $0x30] ss:$12 sps:$4 sm:$0xff]  }
   0x9   :  { %v2589_v21 = vld [vmem:[%s3513_s0 + $0x240] ss:$12 sps:$4 sm:$0xff]   ;;  %v2598_v26 = vld [vmem:[%s3513_s0 + $0x258] ss:$12 sps:$4 sm:$0xff]   ;;  %v2604_v30 = vld [vmem:[%s3513_s0 + $0x270] ss:$12 sps:$4 sm:$0xff]  }
   0xa   :  { %869 = vmatpush1.bf16.msra.mxu0 %v2572_v3  ;;  %2555 = vmatpush1.bf16.msra.mxu1 %v2572_v3  ;;  %v2617_v24 = vld [vmem:[%s3512_s1 + $0x88] sm:$0xff]   ;;  %v2599_v27 = vld [vmem:[%s3513_s0 + $0x34] ss:$12 sps:$4 sm:$0xff]   ;;  %v2611_v35 = vld [vmem:[%s3513_s0 + $0x64] ss:$12 sps:$4 sm:$0xff]  }
   0xb   :  { %870 = vmatprep.subr.bf16.mxu0 %v2716_v0  ;;  %2540 = vmatprep.subr.bf16.mxu1 %v2716_v0  ;;  %v2601_v28 = vld [vmem:[%s3513_s0 + $0x274] ss:$12 sps:$4 sm:$0xff]   ;;  %v2605_v31 = vld [vmem:[%s3513_s0 + $0x4c] ss:$12 sps:$4 sm:$0xff]   ;;  %v2613_v36 = vld [vmem:[%s3513_s0 + $0x2a4] ss:$12 sps:$4 sm:$0xff]  }
   0xc   :  { %v2607_v32 = vld [vmem:[%s3513_s0 + $0x28c] ss:$12 sps:$4 sm:$0xff]   ;;  %v2609_v33 = vld [vmem:[%s3513_s0 + $0x48] ss:$12 sps:$4 sm:$0xff]   ;;  %v2628_v45 = vld [vmem:[%s3513_s0 + $0x90] ss:$12 sps:$4 sm:$0xff]  }
   0xd   :  { %v2610_v34 = vld [vmem:[%s3513_s0 + $0x288] ss:$12 sps:$4 sm:$0xff]   ;;  %v2615_v37 = vld [vmem:[%s3513_s0 + $0x60] ss:$12 sps:$4 sm:$0xff]   ;;  %v2622_v41 = vld [vmem:[%s3513_s0 + $0x78] ss:$12 sps:$4 sm:$0xff]  }
   0xe   :  { %871 = vmatpush1.bf16.msra.mxu0 %v2573_v4  ;;  %2556 = vmatpush1.bf16.msra.mxu1 %v2573_v4  ;;  %v2616_v38 = vld [vmem:[%s3513_s0 + $0x2a0] ss:$12 sps:$4 sm:$0xff]   ;;  %v2618_v39 = vld [vmem:[%s3513_s0 + $0x7c] ss:$12 sps:$4 sm:$0xff]   ;;  %v2623_v42 = vld [vmem:[%s3513_s0 + $0x2b8] ss:$12 sps:$4 sm:$0xff]  }
   0xf   :  { %872 = vmatprep.subr.bf16.mxu0 %v2716_v0  ;;  %2541 = vmatprep.subr.bf16.mxu1 %v2716_v0  ;;  %v2620_v40 = vld [vmem:[%s3513_s0 + $0x2bc] ss:$12 sps:$4 sm:$0xff]   ;;  %v2624_v43 = vld [vmem:[%s3513_s0 + $0x94] ss:$12 sps:$4 sm:$0xff]   ;;  %v2630_v47 = vld [vmem:[%s3513_s0 + $0xac] ss:$12 sps:$4 sm:$0xff]  }
  0x10   :  { %v2626_v44 = vld [vmem:[%s3513_s0 + $0x2d4] ss:$12 sps:$4 sm:$0xff]   ;;  %v2629_v46 = vld [vmem:[%s3513_s0 + $0x2d0] ss:$12 sps:$4 sm:$0xff]   ;;  %v2632_v48 = vld [vmem:[%s3513_s0 + $0x2ec] ss:$12 sps:$4 sm:$0xff]  }
  0x11   :  { %v2634_v49 = vld [vmem:[%s3513_s0 + $0xa8] ss:$12 sps:$4 sm:$0xff]   ;;  %v2636_v51 = vld [vmem:[%s3513_s0 + $0xc4] ss:$12 sps:$4 sm:$0xff]   ;;  %v2639_v53 = vld [vmem:[%s3513_s0 + $0xc0] ss:$12 sps:$4 sm:$0xff]  }
  0x12   :  { %873 = vmatpush1.bf16.msra.mxu0 %v2574_v5  ;;  %2557 = vmatpush1.bf16.msra.mxu1 %v2574_v5  ;;  %v2635_v50 = vld [vmem:[%s3513_s0 + $0x2e8] ss:$12 sps:$4 sm:$0xff]   ;;  %v2640_v54 = vld [vmem:[%s3513_s0 + $0x20] ss:$12 sps:$4 sm:$0xff]   ;;  %v2643_v56 = vld [vmem:[%s3513_s0 + $0x38] ss:$12 sps:$4 sm:$0xff]  }
  0x13   :  { %874 = vmatprep.subr.bf16.mxu0 %v2716_v0  ;;  %2542 = vmatprep.subr.bf16.mxu1 %v2716_v0  ;;  %v2638_v52 = vld [vmem:[%s3513_s0 + $0x8] ss:$12 sps:$4 sm:$0xff]   ;;  %v2644_v57 = vld [vmem:[%s3513_s0 + $0xd8] ss:$12 sps:$4 sm:$0xff]   ;;  %v2645_v58 = vld [vmem:[%s3513_s0 + $0x50] ss:$12 sps:$4 sm:$0xff]  }
  0x14   :  { %v2641_v55 = vld [vmem:[%s3513_s0 + $0xdc] ss:$12 sps:$4 sm:$0xff]   ;;  %v2646_v59 = vld [vmem:[%s3513_s0 + $0xf4] ss:$12 sps:$4 sm:$0xff]   ;;  %v2651_v63 = vld [vmem:[%s3513_s0 + $0x10c] ss:$12 sps:$4 sm:$0xff]  }
  0x15   :  { %v2648_v60 = vld [vmem:[%s3513_s0 + $0x68] ss:$12 sps:$4 sm:$0xff]   ;;  %v2649_v61 = vld [vmem:[%s3513_s0 + $0xf0] ss:$12 sps:$4 sm:$0xff]   ;;  %v2650_v62 = vld [vmem:[%s3513_s0 + $0x80] ss:$12 sps:$4 sm:$0xff]  }
  0x16   :  { %875 = vmatpush1.bf16.msra.mxu0 %v2575_v7  ;;  %2558 = vmatpush1.bf16.msra.mxu1 %v2575_v7  ;;  %v2654_v1 = vld [vmem:[%s3513_s0 + $0x108] ss:$12 sps:$4 sm:$0xff]   ;;  %v2655_v2 = vld [vmem:[%s3513_s0 + $0xb0] ss:$12 sps:$4 sm:$0xff]   ;;  %v2659_v5 = vld [vmem:[%s3513_s0 + $0x120] ss:$12 sps:$4 sm:$0xff]  }
  0x17   :  { %876 = vmatprep.subr.bf16.mxu0 %v2716_v0  ;;  %2543 = vmatprep.subr.bf16.mxu1 %v2716_v0  ;;  %v2656_v3 = vld [vmem:[%s3513_s0 + $0x124] ss:$12 sps:$4 sm:$0xff]   ;;  %v2658_v4 = vld [vmem:[%s3513_s0 + $0xc8] ss:$12 sps:$4 sm:$0xff]   ;;  %v2660_v6 = vld [vmem:[%s3513_s0 + $0xe0] ss:$12 sps:$4 sm:$0xff]  }
  0x18   :  { %v2661_v7 = vld [vmem:[%s3513_s0 + $0x13c] ss:$12 sps:$4 sm:$0xff]   ;;  %v2663_v8 = vld [vmem:[%s3513_s0 + $0xf8] ss:$12 sps:$4 sm:$0xff]  }
  0x1a   :  { %877 = vmatpush1.bf16.msra.mxu0 %v2576_v9  ;;  %2559 = vmatpush1.bf16.msra.mxu1 %v2576_v9  ;;  %v2664_v9 = vld [vmem:[%s3513_s0 + $0x138] ss:$12 sps:$4 sm:$0xff]  }
  0x1b   :  { %878 = vmatprep.subr.bf16.mxu0 %v2716_v0  ;;  %2544 = vmatprep.subr.bf16.mxu1 %v2716_v0 }
  0x1e   :  { %879 = vmatpush1.bf16.msra.mxu0 %v2577_v10  ;;  %2560 = vmatpush1.bf16.msra.mxu1 %v2577_v10  ;;  %v2665_v10 = vld [vmem:[%s3513_s0 + $0x110] ss:$12 sps:$4 sm:$0xff]  }
  0x1f   :  { %880 = vmatprep.subr.bf16.mxu0 %v2716_v0  ;;  %2545 = vmatprep.subr.bf16.mxu1 %v2716_v0 }
  0x22   :  { %881 = vmatpush1.bf16.msra.mxu0 %v2578_v11  ;;  %2561 = vmatpush1.bf16.msra.mxu1 %v2578_v11  ;;  %v2666_v11 = vld [vmem:[%s3513_s0 + $0x154] ss:$12 sps:$4 sm:$0xff]  }
  0x23   :  { %882 = vmatprep.subr.bf16.mxu0 %v2716_v0  ;;  %2546 = vmatprep.subr.bf16.mxu1 %v2716_v0 }
  0x26   :  { %883 = vmatpush1.bf16.msra.mxu0 %v2579_v12  ;;  %2562 = vmatpush1.bf16.msra.mxu1 %v2579_v12  ;;  %v2668_v12 = vld [vmem:[%s3513_s0 + $0x128] ss:$12 sps:$4 sm:$0xff]  }
  0x27   :  { %884 = vmatprep.subr.bf16.mxu0 %v2716_v0  ;;  %2547 = vmatprep.subr.bf16.mxu1 %v2716_v0 }
  0x2a   :  { %885 = vmatpush1.bf16.msra.mxu0 %v2580_v13  ;;  %2563 = vmatpush1.bf16.msra.mxu1 %v2580_v13  ;;  %v2669_v13 = vld [vmem:[%s3513_s0 + $0x150] ss:$12 sps:$4 sm:$0xff]  }
  0x2b   :  { %886 = vmatprep.subr.bf16.mxu0 %v2716_v0  ;;  %2548 = vmatprep.subr.bf16.mxu1 %v2716_v0 }
  0x2e   :  { %887 = vmatpush1.bf16.msra.mxu0 %v2581_v14  ;;  %2564 = vmatpush1.bf16.msra.mxu1 %v2581_v14  ;;  %v2670_v14 = vld [vmem:[%s3513_s0 + $0x140] ss:$12 sps:$4 sm:$0xff]  }
  0x2f   :  { %888 = vmatprep.subr.bf16.mxu0 %v2716_v0  ;;  %2549 = vmatprep.subr.bf16.mxu1 %v2716_v0 }
  0x32   :  { %889 = vmatpush1.bf16.msra.mxu0 %v2582_v15  ;;  %2565 = vmatpush1.bf16.msra.mxu1 %v2582_v15  ;;  %v2671_v15 = vld [vmem:[%s3513_s0 + $0x16c] ss:$12 sps:$4 sm:$0xff]  }
  0x33   :  { %890 = vmatprep.subr.bf16.mxu0 %v2716_v0  ;;  %2550 = vmatprep.subr.bf16.mxu1 %v2716_v0 }
  0x36   :  { %891 = vmatpush1.bf16.msra.mxu0 %v2583_v16  ;;  %2566 = vmatpush1.bf16.msra.mxu1 %v2583_v16  ;;  %v2673_v16 = vld [vmem:[%s3513_s0 + $0x158] ss:$12 sps:$4 sm:$0xff]  }
  0x37   :  { %892 = vmatprep.subr.bf16.mxu0 %v2716_v0  ;;  %2551 = vmatprep.subr.bf16.mxu1 %v2716_v0 }
  0x3a   :  { %893 = vmatpush1.bf16.msra.mxu0 %v2584_v17  ;;  %2567 = vmatpush1.bf16.msra.mxu1 %v2584_v17  ;;  %v2674_v17 = vld [vmem:[%s3513_s0 + $0x168] ss:$12 sps:$4 sm:$0xff]  }
  0x3b   :  { %894 = vmatprep.subr.bf16.mxu0 %v2716_v0  ;;  %2552 = vmatprep.subr.bf16.mxu1 %v2716_v0  ;;  %v2653_v0 = vld [vmem:[%s3513_s0 + $0x98] ss:$12 sps:$4 sm:$0xff]  }
  0x3e   :  { %895 = vmatpush1.bf16.msra.mxu0 %v2585_v18  ;;  %2568 = vmatpush1.bf16.msra.mxu1 %v2585_v18  ;;  %v2675_v18 = vld [vmem:[%s3513_s0 + $0x170] ss:$12 sps:$4 sm:$0xff]  }
  0x3f   :  { %2469 = vmatprep.subr.bf16.mxu1 %v2592_v19 }
  0x41   :  { %897 = vmatmul.mubr.bf16.vlgmr.msra.gmra.mrb[0].mxu0 %v2586_v20  ;;  %1089 = vmatmul.mubr.bf16.vlgmr.msra.gmra.mrb[0].mxu1 %v2589_v21  ;;  %v2678_v20 = vld [vmem:[%s3513_s0 + $0x188] ss:$12 sps:$4 sm:$0xff]   ;;  %v2679_v21 = vld [vmem:[%s3513_s0 + $0x180] ss:$12 sps:$4 sm:$0xff]  }
  0x42   :  { %2470 = vmatpush3.bf16.msra.mxu1 %v2592_v19  ;;  %904 = vmatprep.mubr.bf16.mxu0 %v2593_v22  ;;  %v2676_v19 = vld [vmem:[%s3513_s0 + $0x184] ss:$12 sps:$4 sm:$0xff]   ;;  %v2680_v22 = vld [vmem:[%s3513_s0 + $0x1a0] ss:$12 sps:$4 sm:$0xff]  }
  0x43   :  { %1096 = vmatprep.mubr.bf16.mxu1 %v2595_v23  ;;  %2471 = vmatprep.subr.bf16.mxu1 %v2617_v24  ;;  %v2681_v23 = vld [vmem:[%s3513_s0 + $0x19c] ss:$12 sps:$4 sm:$0xff]  }
  0x46   :  { %2472 = vmatpush3.bf16.msra.mxu1 %v2617_v24  ;;  %v2683_v24 = vld [vmem:[%s3513_s0 + $0x1b8] ss:$12 sps:$4 sm:$0xff]  }
  0x49   :  { %905 = vmatmul.mubr.bf16.gmra.mrb[4].mxu0 %v2597_v25  ;;  %1097 = vmatmul.mubr.bf16.gmra.mrb[4].mxu1 %v2598_v26  ;;  %v2684_v25 = vld [vmem:[%s3513_s0 + $0x198] ss:$12 sps:$4 sm:$0xff]   ;;  %v2685_v26 = vld [vmem:[%s3513_s0 + $0x1d0] ss:$12 sps:$4 sm:$0xff]  }
  0x4a   :  { %912 = vmatprep.mubr.bf16.mxu0 %v2599_v27  ;;  %1104 = vmatprep.mubr.bf16.mxu1 %v2601_v28  ;;  %v2686_v27 = vld [vmem:[%s3513_s0 + $0x1b4] ss:$12 sps:$4 sm:$0xff]  }
  0x4b   :  { %v2688_v28 = vld [vmem:[%s3513_s0 + $0x1e8] ss:$12 sps:$4 sm:$0xff]  }
  0x51   :  { %913 = vmatmul.mubr.bf16.gmra.mrb[8].mxu0 %v2603_v29  ;;  %1105 = vmatmul.mubr.bf16.gmra.mrb[8].mxu1 %v2604_v30  ;;  %v2689_v29 = vld [vmem:[%s3513_s0 + $0x1b0] ss:$12 sps:$4 sm:$0xff]   ;;  %v2690_v30 = vld [vmem:[%s3513_s0 + $0x200] ss:$12 sps:$4 sm:$0xff]  }
  0x52   :  { %920 = vmatprep.mubr.bf16.mxu0 %v2605_v31  ;;  %1112 = vmatprep.mubr.bf16.mxu1 %v2607_v32  ;;  %v2691_v31 = vld [vmem:[%s3513_s0 + $0x1cc] ss:$12 sps:$4 sm:$0xff]  }
  0x53   :  { %v2693_v32 = vld [vmem:[%s3513_s0 + $0x218] ss:$12 sps:$4 sm:$0xff]  }
  0x59   :  { %921 = vmatmul.mubr.bf16.gmra.mrb[12].mxu0 %v2609_v33  ;;  %1113 = vmatmul.mubr.bf16.gmra.mrb[12].mxu1 %v2610_v34  ;;  %v2694_v33 = vld [vmem:[%s3513_s0 + $0x1c8] ss:$12 sps:$4 sm:$0xff]   ;;  %v2695_v34 = vld [vmem:[%s3513_s0 + $0x230] ss:$12 sps:$4 sm:$0xff]  }
  0x5a   :  { %928 = vmatprep.mubr.bf16.mxu0 %v2611_v35  ;;  %1120 = vmatprep.mubr.bf16.mxu1 %v2613_v36  ;;  %v2696_v35 = vld [vmem:[%s3513_s0 + $0x1e4] ss:$12 sps:$4 sm:$0xff]   ;;  %v2698_v36 = vld [vmem:[%s3513_s0 + $0x248] ss:$12 sps:$4 sm:$0xff]  }
  0x61   :  { %929 = vmatmul.mubr.bf16.gmra.mrb[16].mxu0 %v2615_v37  ;;  %1121 = vmatmul.mubr.bf16.gmra.mrb[16].mxu1 %v2616_v38  ;;  %v2699_v37 = vld [vmem:[%s3513_s0 + $0x1e0] ss:$12 sps:$4 sm:$0xff]  }
  0x62   :  { %936 = vmatprep.mubr.bf16.mxu0 %v2618_v39  ;;  %1128 = vmatprep.mubr.bf16.mxu1 %v2620_v40  ;;  %v2700_v38 = vld [vmem:[%s3513_s0 + $0x260] ss:$12 sps:$4 sm:$0xff]   ;;  %v2701_v39 = vld [vmem:[%s3513_s0 + $0x1fc] ss:$12 sps:$4 sm:$0xff]   ;;  %v2703_v40 = vld [vmem:[%s3513_s0 + $0x278] ss:$12 sps:$4 sm:$0xff]  }
  0x69   :  { %937 = vmatmul.mubr.bf16.gmra.mrb[20].mxu0 %v2622_v41  ;;  %1129 = vmatmul.mubr.bf16.gmra.mrb[20].mxu1 %v2623_v42  ;;  %v2704_v41 = vld [vmem:[%s3513_s0 + $0x1f8] ss:$12 sps:$4 sm:$0xff]   ;;  %v2705_v42 = vld [vmem:[%s3513_s0 + $0x290] ss:$12 sps:$4 sm:$0xff]  }
  0x6a   :  { %944 = vmatprep.mubr.bf16.mxu0 %v2624_v43  ;;  %1136 = vmatprep.mubr.bf16.mxu1 %v2626_v44  ;;  %v2706_v43 = vld [vmem:[%s3513_s0 + $0x214] ss:$12 sps:$4 sm:$0xff]  }
  0x6b   :  { %v2708_v44 = vld [vmem:[%s3513_s0 + $0x2a8] ss:$12 sps:$4 sm:$0xff]  }
  0x71   :  { %945 = vmatmul.mubr.bf16.gmra.mrb[24].mxu0 %v2628_v45  ;;  %1137 = vmatmul.mubr.bf16.gmra.mrb[24].mxu1 %v2629_v46  ;;  %v2709_v45 = vld [vmem:[%s3513_s0 + $0x210] ss:$12 sps:$4 sm:$0xff]   ;;  %v2710_v46 = vld [vmem:[%s3513_s0 + $0x2c0] ss:$12 sps:$4 sm:$0xff]  }
  0x72   :  { %952 = vmatprep.mubr.bf16.mxu0 %v2630_v47  ;;  %1144 = vmatprep.mubr.bf16.mxu1 %v2632_v48  ;;  %v2711_v47 = vld [vmem:[%s3513_s0 + $0x22c] ss:$12 sps:$4 sm:$0xff]  }
  0x73   :  { %v2713_v48 = vld [vmem:[%s3513_s0 + $0x2d8] ss:$12 sps:$4 sm:$0xff]  }
  0x79   :  { %953 = vmatmul.mubr.bf16.gmra.mrb[28].mxu0 %v2634_v49  ;;  %1145 = vmatmul.mubr.bf16.gmra.mrb[28].mxu1 %v2635_v50  ;;  %v2714_v49 = vld [vmem:[%s3513_s0 + $0x228] ss:$12 sps:$4 sm:$0xff]   ;;  %v2715_v50 = vld [vmem:[%s3513_s0 + $0x2f0] ss:$12 sps:$4 sm:$0xff]  }
  0x7a   :  { %960 = vmatprep.mubr.bf16.mxu0 %v2636_v51  ;;  %2473 = vmatprep.mubr.msk.bf16.mxu1 %vm767_vm0, %v2638_v52 }
  0x81   :  { %961 = vmatmul.mubr.bf16.gmra.mrb[32].mxu0 %v2639_v53  ;;  %2474 = vmatmul.mubr.msk.bf16.vlgmr.msra.gmra.mrb[32].mxu1 %vm767_vm0, %v2640_v54 }
  0x82   :  { %968 = vmatprep.mubr.bf16.mxu0 %v2641_v55  ;;  %2477 = vmatprep.mubr.msk.bf16.mxu1 %vm767_vm0, %v2643_v56 }
  0x89   :  { %969 = vmatmul.mubr.bf16.gmra.mrb[36].mxu0 %v2644_v57  ;;  %2478 = vmatmul.mubr.msk.bf16.gmra.mrb[36].mxu1 %vm767_vm0, %v2645_v58 }
  0x8a   :  { %976 = vmatprep.mubr.bf16.mxu0 %v2646_v59  ;;  %2481 = vmatprep.mubr.msk.bf16.mxu1 %vm767_vm0, %v2648_v60 }
  0x91   :  { %977 = vmatmul.mubr.bf16.gmra.mrb[40].mxu0 %v2649_v61  ;;  %2482 = vmatmul.mubr.msk.bf16.gmra.mrb[40].mxu1 %vm767_vm0, %v2650_v62 }
  0x92   :  { %984 = vmatprep.mubr.bf16.mxu0 %v2651_v63  ;;  %2485 = vmatprep.mubr.msk.bf16.mxu1 %vm767_vm0, %v2653_v0 }
  0x99   :  { %985 = vmatmul.mubr.bf16.gmra.mrb[44].mxu0 %v2654_v1  ;;  %2486 = vmatmul.mubr.msk.bf16.gmra.mrb[44].mxu1 %vm767_vm0, %v2655_v2 }
  0x9a   :  { %992 = vmatprep.mubr.bf16.mxu0 %v2656_v3  ;;  %2489 = vmatprep.mubr.msk.bf16.mxu1 %vm767_vm0, %v2658_v4 }
  0xa1   :  { %993 = vmatmul.mubr.bf16.gmra.mrb[48].mxu0 %v2659_v5  ;;  %2490 = vmatmul.mubr.msk.bf16.gmra.mrb[48].mxu1 %vm767_vm0, %v2660_v6 }
  0xa2   :  { %1000 = vmatprep.mubr.bf16.mxu0 %v2661_v7  ;;  %2493 = vmatprep.mubr.msk.bf16.mxu1 %vm767_vm0, %v2663_v8 }
  0xa9   :  { %1001 = vmatmul.mubr.bf16.gmra.mrb[52].mxu0 %v2664_v9  ;;  %2494 = vmatmul.mubr.msk.bf16.gmra.mrb[52].mxu1 %vm767_vm0, %v2665_v10 }
  0xaa   :  { %1008 = vmatprep.mubr.bf16.mxu0 %v2666_v11  ;;  %2497 = vmatprep.mubr.msk.bf16.mxu1 %vm767_vm0, %v2668_v12 }
  0xb1   :  { %1009 = vmatmul.mubr.bf16.gmra.mrb[56].mxu0 %v2669_v13  ;;  %2498 = vmatmul.mubr.msk.bf16.gmra.mrb[56].mxu1 %vm767_vm0, %v2670_v14 }
  0xb2   :  { %1016 = vmatprep.mubr.bf16.mxu0 %v2671_v15  ;;  %2501 = vmatprep.mubr.msk.bf16.mxu1 %vm767_vm0, %v2673_v16 }
  0xb9   :  { %1017 = vmatmul.mubr.bf16.gmra.mrb[60].mxu0 %v2674_v17  ;;  %2502 = vmatmul.mubr.msk.bf16.gmra.mrb[60].mxu1 %vm767_vm0, %v2675_v18 }
  0xba   :  { %1024 = vmatprep.mubr.bf16.mxu0 %v2676_v19  ;;  %2505 = vmatprep.mubr.msk.bf16.mxu1 %vm767_vm0, %v2678_v20 }
  0xc1   :  { %1025 = vmatmul.mubr.bf16.gmra.mrb[64].mxu0 %v2679_v21  ;;  %2506 = vmatmul.mubr.msk.bf16.gmra.mrb[64].mxu1 %vm767_vm0, %v2680_v22 }
  0xc2   :  { %1032 = vmatprep.mubr.bf16.mxu0 %v2681_v23  ;;  %2509 = vmatprep.mubr.msk.bf16.mxu1 %vm767_vm0, %v2683_v24 }
  0xc9   :  { %1033 = vmatmul.mubr.bf16.gmra.mrb[68].mxu0 %v2684_v25  ;;  %2510 = vmatmul.mubr.msk.bf16.gmra.mrb[68].mxu1 %vm767_vm0, %v2685_v26 }
  0xca   :  { %1040 = vmatprep.mubr.bf16.mxu0 %v2686_v27  ;;  %2513 = vmatprep.mubr.msk.bf16.mxu1 %vm767_vm0, %v2688_v28 }
  0xd1   :  { %1041 = vmatmul.mubr.bf16.gmra.mrb[72].mxu0 %v2689_v29  ;;  %2514 = vmatmul.mubr.msk.bf16.gmra.mrb[72].mxu1 %vm767_vm0, %v2690_v30 }
  0xd2   :  { %1048 = vmatprep.mubr.bf16.mxu0 %v2691_v31  ;;  %2517 = vmatprep.mubr.msk.bf16.mxu1 %vm767_vm0, %v2693_v32 }
  0xd9   :  { %1049 = vmatmul.mubr.bf16.gmra.mrb[76].mxu0 %v2694_v33  ;;  %2518 = vmatmul.mubr.msk.bf16.gmra.mrb[76].mxu1 %vm767_vm0, %v2695_v34 }
  0xda   :  { %1056 = vmatprep.mubr.bf16.mxu0 %v2696_v35  ;;  %2521 = vmatprep.mubr.msk.bf16.mxu1 %vm767_vm0, %v2698_v36 }
  0xe1   :  { %1057 = vmatmul.mubr.bf16.gmra.mrb[80].mxu0 %v2699_v37  ;;  %2522 = vmatmul.mubr.msk.bf16.gmra.mrb[80].mxu1 %vm767_vm0, %v2700_v38 }
  0xe2   :  { %1064 = vmatprep.mubr.bf16.mxu0 %v2701_v39  ;;  %2525 = vmatprep.mubr.msk.bf16.mxu1 %vm767_vm0, %v2703_v40 }
  0xe9   :  { %1065 = vmatmul.mubr.bf16.gmra.mrb[84].mxu0 %v2704_v41  ;;  %2526 = vmatmul.mubr.msk.bf16.gmra.mrb[84].mxu1 %vm767_vm0, %v2705_v42 }
  0xea   :  { %1072 = vmatprep.mubr.bf16.mxu0 %v2706_v43  ;;  %2529 = vmatprep.mubr.msk.bf16.mxu1 %vm767_vm0, %v2708_v44 }
  0xf1   :  { %1073 = vmatmul.mubr.bf16.gmra.mrb[88].mxu0 %v2709_v45  ;;  %2530 = vmatmul.mubr.msk.bf16.gmra.mrb[88].mxu1 %vm767_vm0, %v2710_v46 }
  0xf2   :  { %1080 = vmatprep.mubr.bf16.mxu0 %v2711_v47  ;;  %2533 = vmatprep.mubr.msk.bf16.mxu1 %vm767_vm0, %v2713_v48 }
  0xf9   :  { %1081 = vmatmul.mubr.bf16.gmra.mrb[92].mxu0 %v2714_v49  ;;  %2534 = vmatmul.mubr.msk.bf16.gmra.mrb[92].mxu1 %vm767_vm0, %v2715_v50 }
 0x114   :  { %v3143_v51 = vpop.f32.mrb[0].mxu0  ;;  %v3145_v52 = vpop.f32.mrb[0].mxu1 }
 0x115   :  { %v900_v53 = vpop.f32.mrb[1].mxu0  ;;  %v1092_v54 = vpop.f32.mrb[1].mxu1 }
 0x116   :  { %v3147_v55 = vpop.f32.mrb[2].mxu0  ;;  %v3149_v56 = vpop.f32.mrb[2].mxu1 }
 0x117   :  { %v903_v57 = vpop.f32.mrb[3].mxu0  ;;  %v1095_v58 = vpop.f32.mrb[3].mxu1 }
 0x118   :  { %v3210_v57 = vld [vmem:[%s3514_s2] ss:$0 sm:$0xff] }
 0x11c   :  { %v906_v59 = vpop.f32.mrb[4].mxu0  ;;  %v3151_v60 = vpop.f32.mrb[4].mxu1 }
 0x11d   :  { %v908_v61 = vpop.f32.mrb[5].mxu0  ;;  %v1100_v62 = vpop.f32.mrb[5].mxu1 }
 0x11e   :  { %v3153_v63 = vpop.f32.mrb[6].mxu0  ;;  %v3155_v0 = vpop.f32.mrb[6].mxu1 }
 0x11f   :  { %v911_v1 = vpop.f32.mrb[7].mxu0  ;;  %v1103_v2 = vpop.f32.mrb[7].mxu1 }
 0x120   :  { %v3215_v1 = vld [vmem:[%s3514_s2 + $0x1] ss:$0 sm:$0xff] }
 0x124   :  { %v3157_v3 = vpop.f32.mrb[8].mxu0  ;;  %v3159_v4 = vpop.f32.mrb[8].mxu1 }
 0x125   :  { %v916_v5 = vpop.f32.mrb[9].mxu0  ;;  %v1108_v6 = vpop.f32.mrb[9].mxu1 }
 0x126   :  { %v3161_v7 = vpop.f32.mrb[10].mxu0  ;;  %v3163_v8 = vpop.f32.mrb[10].mxu1 }
 0x127   :  { %v919_v9 = vpop.f32.mrb[11].mxu0  ;;  %v1111_v10 = vpop.f32.mrb[11].mxu1 }
 0x12c   :  { %v3165_v11 = vpop.f32.mrb[12].mxu0  ;;  %v3167_v12 = vpop.f32.mrb[12].mxu1 }
 0x12d   :  { %v924_v13 = vpop.f32.mrb[13].mxu0  ;;  %v1116_v14 = vpop.f32.mrb[13].mxu1 }
 0x12e   :  { %v3169_v15 = vpop.f32.mrb[14].mxu0  ;;  %v3171_v16 = vpop.f32.mrb[14].mxu1 }
 0x12f   :  { %v927_v17 = vpop.f32.mrb[15].mxu0  ;;  %v1119_v18 = vpop.f32.mrb[15].mxu1 }
 0x134   :  { %v3173_v19 = vpop.f32.mrb[16].mxu0  ;;  %v3175_v20 = vpop.f32.mrb[16].mxu1 }
 0x135   :  { %v932_v21 = vpop.f32.mrb[17].mxu0  ;;  %v1124_v22 = vpop.f32.mrb[17].mxu1 }
 0x136   :  { %v3177_v23 = vpop.f32.mrb[18].mxu0  ;;  %v3179_v24 = vpop.f32.mrb[18].mxu1 }
 0x137   :  { %v935_v25 = vpop.f32.mrb[19].mxu0  ;;  %v1127_v26 = vpop.f32.mrb[19].mxu1 }
 0x13c   :  { %v3181_v27 = vpop.f32.mrb[20].mxu0  ;;  %v3183_v28 = vpop.f32.mrb[20].mxu1 }
 0x13d   :  { %v940_v29 = vpop.f32.mrb[21].mxu0  ;;  %v1132_v30 = vpop.f32.mrb[21].mxu1 }
 0x13e   :  { %v3185_v31 = vpop.f32.mrb[22].mxu0  ;;  %v3187_v32 = vpop.f32.mrb[22].mxu1 }
 0x13f   :  { %v943_v33 = vpop.f32.mrb[23].mxu0  ;;  %v1135_v34 = vpop.f32.mrb[23].mxu1 }
 0x144   :  { %v3189_v35 = vpop.f32.mrb[24].mxu0  ;;  %v3191_v36 = vpop.f32.mrb[24].mxu1 }
 0x145   :  { %v948_v37 = vpop.f32.mrb[25].mxu0  ;;  %v1140_v38 = vpop.f32.mrb[25].mxu1 }
 0x146   :  { %v3193_v39 = vpop.f32.mrb[26].mxu0  ;;  %v3195_v40 = vpop.f32.mrb[26].mxu1 }
 0x147   :  { %v951_v41 = vpop.f32.mrb[27].mxu0  ;;  %v1143_v42 = vpop.f32.mrb[27].mxu1 }
 0x14c   :  { %v3197_v43 = vpop.f32.mrb[28].mxu0  ;;  %v3199_v44 = vpop.f32.mrb[28].mxu1 }
 0x14d   :  { %v956_v45 = vpop.f32.mrb[29].mxu0  ;;  %v1148_v46 = vpop.f32.mrb[29].mxu1 }
 0x14e   :  { %v3201_v47 = vpop.f32.mrb[30].mxu0  ;;  %v3203_v48 = vpop.f32.mrb[30].mxu1 }
 0x14f   :  { %v959_v49 = vpop.f32.mrb[31].mxu0  ;;  %v1151_v50 = vpop.f32.mrb[31].mxu1 }
 0x154   :  { %v3205_v53 = vpop.f32.mrb[32].mxu0  ;;  %v2475_v54 = vpop.f32.mrb[32].mxu1 }
 0x155   :  { %v1196_v58 = vadd.f32 %v2475_v54, %v906_v59  ;;  %v964_v61 = vpop.f32.mrb[33].mxu0  ;;  %v1187_v62 = vpop.f32.mrb[33].mxu1 }
 0x156   :  { %v1188_v2 = vadd.f32 %v1187_v62, %v3143_v51  ;;  %v3218_v5 = vpop.f32.mrb[34].mxu0  ;;  %v2476_v6 = vpop.f32.mrb[34].mxu1 }
 0x157   :  { %v1449_v9 = vmul.f32 %v3210_v57, %v1196_v58  ;;  %v1199_v10 = vadd.f32 %v2476_v6, %v3153_v63  ;;  %v967_v13 = vpop.f32.mrb[35].mxu0  ;;  %v1190_v14 = vpop.f32.mrb[35].mxu1 }
 0x158   :  { %v1447_v59 = vmul.f32 %v3210_v57, %v1188_v2  ;;  %v1191_v17 = vadd.f32 %v1190_v14, %v3147_v55 }
 0x159   :  { %v1518_v18 = vadd.f32 %v3215_v1, %v1449_v9  ;;  %v1450_v21 = vmul.f32 %v3210_v57, %v1199_v10 }
 0x15a   :  { %v1516_v22 = vadd.f32 %v3215_v1, %v1447_v59  ;;  %v1448_v51 = vmul.f32 %v3210_v57, %v1191_v17 }
 0x15b   :  { %v1519_v25 = vadd.f32 %v3215_v1, %v1450_v21  ;;  %v1582_v30 = vmax.f32 %v1518_v18, 0.0 }
 0x15c   :  { %v1517_v26 = vadd.f32 %v3215_v1, %v1448_v51  ;;  %v3230_v29 = vpop.f32.mrb[36].mxu0  ;;  %v2479_v63 = vpop.f32.mrb[36].mxu1  ;;  %v1580_v38 = vmax.f32 %v1516_v22, 0.0 }
 0x15d   :  { %v1583_v33 = vmax.f32 %v1519_v25, 0.0  ;;  %v1212_v34 = vadd.f32 %v2479_v63, %v3165_v11  ;;  %v972_v55 = vpop.f32.mrb[37].mxu0  ;;  %v1203_v37 = vpop.f32.mrb[37].mxu1 }
 0x15e   :  { %v1581_v41 = vmax.f32 %v1517_v26, 0.0  ;;  %v1204_v42 = vadd.f32 %v1203_v37, %v3157_v3  ;;  %v3234_v45 = vpop.f32.mrb[38].mxu0  ;;  %v2480_v46 = vpop.f32.mrb[38].mxu1 }
 0x15f   :  { %v2252_v49 = vpack.c.bf16 %v1583_v33, %v1582_v30  ;;  %v1453_v50 = vmul.f32 %v3210_v57, %v1212_v34  ;;  %v1215_v54 = vadd.f32 %v2480_v46, %v3169_v15  ;;  %v975_v58 = vpop.f32.mrb[39].mxu0  ;;  %v1206_v61 = vpop.f32.mrb[39].mxu1 }
 0x160   :  { %v2247_v62 = vpack.c.bf16 %v1581_v41, %v1580_v38  ;;  %v1451_v2 = vmul.f32 %v3210_v57, %v1204_v42  ;;  %v1207_v11 = vadd.f32 %v1206_v61, %v3161_v7 }
 0x161   :  { %2404 = vst [vmem:[%s3515_s3 + $0x8] sm:$0xff] %v2252_v49   ;;  %v1522_v3 = vadd.f32 %v3215_v1, %v1453_v50  ;;  %v1454_v6 = vmul.f32 %v3210_v57, %v1215_v54 }
 0x162   :  { %2248 = vst [vmem:[%s3515_s3] sm:$0xff] %v2247_v62   ;;  %v1520_v15 = vadd.f32 %v3215_v1, %v1451_v2  ;;  %v1452_v9 = vmul.f32 %v3210_v57, %v1207_v11 }
 0x163   :  { %v1523_v10 = vadd.f32 %v3215_v1, %v1454_v6  ;;  %v1586_v59 = vmax.f32 %v1522_v3, 0.0 }
 0x164   :  { %v1521_v7 = vadd.f32 %v3215_v1, %v1452_v9  ;;  %v3252_v13 = vpop.f32.mrb[40].mxu0  ;;  %v2483_v14 = vpop.f32.mrb[40].mxu1  ;;  %v1584_v51 = vmax.f32 %v1520_v15, 0.0 }
 0x165   :  { %v1587_v17 = vmax.f32 %v1523_v10, 0.0  ;;  %v1228_v18 = vadd.f32 %v2483_v14, %v3181_v27  ;;  %v980_v21 = vpop.f32.mrb[41].mxu0  ;;  %v1219_v22 = vpop.f32.mrb[41].mxu1 }
 0x166   :  { %v1585_v25 = vmax.f32 %v1521_v7, 0.0  ;;  %v1220_v26 = vadd.f32 %v1219_v22, %v3173_v19  ;;  %v3256_v63 = vpop.f32.mrb[42].mxu0  ;;  %v2484_v30 = vpop.f32.mrb[42].mxu1 }
 0x167   :  { %v2262_v33 = vpack.c.bf16 %v1587_v17, %v1586_v59  ;;  %v1457_v34 = vmul.f32 %v3210_v57, %v1228_v18  ;;  %v1231_v55 = vadd.f32 %v2484_v30, %v3185_v31  ;;  %v983_v37 = vpop.f32.mrb[43].mxu0  ;;  %v1222_v38 = vpop.f32.mrb[43].mxu1 }
 0x168   :  { %v2257_v41 = vpack.c.bf16 %v1585_v25, %v1584_v51  ;;  %v1455_v42 = vmul.f32 %v3210_v57, %v1220_v26  ;;  %v1223_v27 = vadd.f32 %v1222_v38, %v3177_v23 }
 0x169   :  { %2406 = vst [vmem:[%s3515_s3 + $0x18] sm:$0xff] %v2262_v33   ;;  %v1526_v19 = vadd.f32 %v3215_v1, %v1457_v34  ;;  %v1458_v46 = vmul.f32 %v3210_v57, %v1231_v55 }
 0x16a   :  { %2405 = vst [vmem:[%s3515_s3 + $0x10] sm:$0xff] %v2257_v41   ;;  %v1524_v31 = vadd.f32 %v3215_v1, %v1455_v42  ;;  %v1456_v49 = vmul.f32 %v3210_v57, %v1223_v27 }
 0x16b   :  { %v1527_v50 = vadd.f32 %v3215_v1, %v1458_v46  ;;  %v1590_v61 = vmax.f32 %v1526_v19, 0.0 }
 0x16c   :  { %v1525_v23 = vadd.f32 %v3215_v1, %v1456_v49  ;;  %v986_v54 = vpop.f32.mrb[44].mxu0  ;;  %v2487_v58 = vpop.f32.mrb[44].mxu1  ;;  %v1588_v6 = vmax.f32 %v1524_v31, 0.0 }
 0x16d   :  { %v1591_v62 = vmax.f32 %v1527_v50, 0.0  ;;  %v1244_v2 = vadd.f32 %v2487_v58, %v3197_v43  ;;  %v988_v11 = vpop.f32.mrb[45].mxu0  ;;  %v1235_v3 = vpop.f32.mrb[45].mxu1 }
 0x16e   :  { %v1589_v15 = vmax.f32 %v1525_v23, 0.0  ;;  %v1236_v9 = vadd.f32 %v1235_v3, %v3189_v35  ;;  %v989_v10 = vpop.f32.mrb[46].mxu0  ;;  %v2488_v7 = vpop.f32.mrb[46].mxu1 }
 0x16f   :  { %v2272_v14 = vpack.c.bf16 %v1591_v62, %v1590_v61  ;;  %v1461_v59 = vmul.f32 %v3210_v57, %v1244_v2  ;;  %v1247_v17 = vadd.f32 %v2488_v7, %v3201_v47  ;;  %v991_v18 = vpop.f32.mrb[47].mxu0  ;;  %v1238_v21 = vpop.f32.mrb[47].mxu1 }
 0x170   :  { %v2267_v22 = vpack.c.bf16 %v1589_v15, %v1588_v6  ;;  %v1459_v51 = vmul.f32 %v3210_v57, %v1236_v9  ;;  %v1239_v43 = vadd.f32 %v1238_v21, %v3193_v39 }
 0x171   :  { %2408 = vst [vmem:[%s3515_s3 + $0x28] sm:$0xff] %v2272_v14   ;;  %v1530_v35 = vadd.f32 %v3215_v1, %v1461_v59  ;;  %v1462_v25 = vmul.f32 %v3210_v57, %v1247_v17 }
 0x172   :  { %2407 = vst [vmem:[%s3515_s3 + $0x20] sm:$0xff] %v2267_v22   ;;  %v1528_v47 = vadd.f32 %v3215_v1, %v1459_v51  ;;  %v1460_v26 = vmul.f32 %v3210_v57, %v1239_v43 }
 0x173   :  { %v1531_v30 = vadd.f32 %v3215_v1, %v1462_v25  ;;  %v1594_v55 = vmax.f32 %v1530_v35, 0.0 }
 0x174   :  { %v1529_v39 = vadd.f32 %v3215_v1, %v1460_v26  ;;  %v3292_v33 = vpop.f32.mrb[48].mxu0  ;;  %v2491_v34 = vpop.f32.mrb[48].mxu1  ;;  %v1592_v27 = vmax.f32 %v1528_v47, 0.0 }
 0x175   :  { %v1595_v37 = vmax.f32 %v1531_v30, 0.0  ;;  %v1260_v38 = vadd.f32 %v2491_v34, %v3230_v29  ;;  %v996_v41 = vpop.f32.mrb[49].mxu0  ;;  %v1251_v42 = vpop.f32.mrb[49].mxu1 }
 0x176   :  { %v1593_v19 = vmax.f32 %v1529_v39, 0.0  ;;  %v1252_v46 = vadd.f32 %v1251_v42, %v3205_v53  ;;  %v3296_v31 = vpop.f32.mrb[50].mxu0  ;;  %v2492_v49 = vpop.f32.mrb[50].mxu1 }
 0x177   :  { %v2282_v50 = vpack.c.bf16 %v1595_v37, %v1594_v55  ;;  %v1465_v23 = vmul.f32 %v3210_v57, %v1260_v38  ;;  %v1263_v58 = vadd.f32 %v2492_v49, %v3234_v45  ;;  %v999_v61 = vpop.f32.mrb[51].mxu0  ;;  %v1254_v62 = vpop.f32.mrb[51].mxu1 }
 0x178   :  { %v2277_v2 = vpack.c.bf16 %v1593_v19, %v1592_v27  ;;  %v1463_v11 = vmul.f32 %v3210_v57, %v1252_v46  ;;  %v1255_v29 = vadd.f32 %v1254_v62, %v3218_v5 }
 0x179   :  { %2410 = vst [vmem:[%s3515_s3 + $0x38] sm:$0xff] %v2282_v50   ;;  %v1534_v53 = vadd.f32 %v3215_v1, %v1465_v23  ;;  %v1466_v3 = vmul.f32 %v3210_v57, %v1263_v58 }
 0x17a   :  { %2409 = vst [vmem:[%s3515_s3 + $0x30] sm:$0xff] %v2277_v2   ;;  %v1532_v45 = vadd.f32 %v3215_v1, %v1463_v11  ;;  %v1464_v6 = vmul.f32 %v3210_v57, %v1255_v29 }
 0x17b   :  { %v1535_v15 = vadd.f32 %v3215_v1, %v1466_v3  ;;  %v1598_v14 = vmax.f32 %v1534_v53, 0.0 }
 0x17c   :  { %v1533_v5 = vadd.f32 %v3215_v1, %v1464_v6  ;;  %v1002_v9 = vpop.f32.mrb[52].mxu0  ;;  %v2495_v7 = vpop.f32.mrb[52].mxu1  ;;  %v1596_v22 = vmax.f32 %v1532_v45, 0.0 }
 0x17d   :  { %v1599_v59 = vmax.f32 %v1535_v15, 0.0  ;;  %v1276_v17 = vadd.f32 %v2495_v7, %v986_v54  ;;  %v1004_v18 = vpop.f32.mrb[53].mxu0  ;;  %v1267_v21 = vpop.f32.mrb[53].mxu1 }
 0x17e   :  { %v1597_v51 = vmax.f32 %v1533_v5, 0.0  ;;  %v1268_v43 = vadd.f32 %v1267_v21, %v3252_v13  ;;  %v1005_v35 = vpop.f32.mrb[54].mxu0  ;;  %v2496_v25 = vpop.f32.mrb[54].mxu1 }
 0x17f   :  { %v2292_v47 = vpack.c.bf16 %v1599_v59, %v1598_v14  ;;  %v1469_v26 = vmul.f32 %v3210_v57, %v1276_v17  ;;  %v1279_v30 = vadd.f32 %v2496_v25, %v989_v10  ;;  %v1007_v39 = vpop.f32.mrb[55].mxu0  ;;  %v1270_v34 = vpop.f32.mrb[55].mxu1 }
 0x180   :  { %v2287_v55 = vpack.c.bf16 %v1597_v51, %v1596_v22  ;;  %v1467_v37 = vmul.f32 %v3210_v57, %v1268_v43  ;;  %v1271_v38 = vadd.f32 %v1270_v34, %v3256_v63 }
 0x181   :  { %2412 = vst [vmem:[%s3515_s3 + $0x48] sm:$0xff] %v2292_v47   ;;  %v1538_v54 = vadd.f32 %v3215_v1, %v1469_v26  ;;  %v1470_v13 = vmul.f32 %v3210_v57, %v1279_v30 }
 0x182   :  { %2411 = vst [vmem:[%s3515_s3 + $0x40] sm:$0xff] %v2287_v55   ;;  %v1536_v10 = vadd.f32 %v3215_v1, %v1467_v37  ;;  %v1468_v41 = vmul.f32 %v3210_v57, %v1271_v38 }
 0x183   :  { %v1539_v42 = vadd.f32 %v3215_v1, %v1470_v13  ;;  %v1602_v46 = vmax.f32 %v1538_v54, 0.0 }
 0x184   :  { %v1537_v63 = vadd.f32 %v3215_v1, %v1468_v41  ;;  %v1010_v27 = vpop.f32.mrb[56].mxu0  ;;  %v2499_v19 = vpop.f32.mrb[56].mxu1  ;;  %v1600_v61 = vmax.f32 %v1536_v10, 0.0 }
 0x185   :  { %v1603_v49 = vmax.f32 %v1539_v42, 0.0  ;;  %v1292_v50 = vadd.f32 %v2499_v19, %v1002_v9  ;;  %v1012_v23 = vpop.f32.mrb[57].mxu0  ;;  %v1283_v58 = vpop.f32.mrb[57].mxu1 }
 0x186   :  { %v1601_v62 = vmax.f32 %v1537_v63, 0.0  ;;  %v1284_v2 = vadd.f32 %v1283_v58, %v3292_v33  ;;  %v1013_v11 = vpop.f32.mrb[58].mxu0  ;;  %v2500_v29 = vpop.f32.mrb[58].mxu1 }
 0x187   :  { %v2302_v53 = vpack.c.bf16 %v1603_v49, %v1602_v46  ;;  %v1473_v3 = vmul.f32 %v3210_v57, %v1292_v50  ;;  %v1295_v45 = vadd.f32 %v2500_v29, %v1005_v35  ;;  %v1015_v6 = vpop.f32.mrb[59].mxu0  ;;  %v1286_v15 = vpop.f32.mrb[59].mxu1 }
 0x188   :  { %v2297_v5 = vpack.c.bf16 %v1601_v62, %v1600_v61  ;;  %v1471_v7 = vmul.f32 %v3210_v57, %v1284_v2  ;;  %v1287_v14 = vadd.f32 %v1286_v15, %v3296_v31 }
 0x189   :  { %2414 = vst [vmem:[%s3515_s3 + $0x58] sm:$0xff] %v2302_v53   ;;  %v1542_v9 = vadd.f32 %v3215_v1, %v1473_v3  ;;  %v1474_v33 = vmul.f32 %v3210_v57, %v1295_v45 }
 0x18a   :  { %2413 = vst [vmem:[%s3515_s3 + $0x50] sm:$0xff] %v2297_v5   ;;  %v1540_v59 = vadd.f32 %v3215_v1, %v1471_v7  ;;  %v1472_v17 = vmul.f32 %v3210_v57, %v1287_v14 }
 0x18b   :  { %v1543_v18 = vadd.f32 %v3215_v1, %v1474_v33  ;;  %v1606_v51 = vmax.f32 %v1542_v9, 0.0 }
 0x18c   :  { %v1541_v31 = vadd.f32 %v3215_v1, %v1472_v17  ;;  %v1018_v21 = vpop.f32.mrb[60].mxu0  ;;  %v2503_v22 = vpop.f32.mrb[60].mxu1  ;;  %v1604_v26 = vmax.f32 %v1540_v59, 0.0 }
 0x18d   :  { %v1607_v43 = vmax.f32 %v1543_v18, 0.0  ;;  %v1308_v35 = vadd.f32 %v2503_v22, %v1018_v21  ;;  %v1020_v25 = vpop.f32.mrb[61].mxu0  ;;  %v1299_v47 = vpop.f32.mrb[61].mxu1 }
 0x18e   :  { %v1605_v30 = vmax.f32 %v1541_v31, 0.0  ;;  %v1300_v39 = vadd.f32 %v1299_v47, %v1010_v27  ;;  %v1021_v34 = vpop.f32.mrb[62].mxu0  ;;  %v2504_v55 = vpop.f32.mrb[62].mxu1 }
 0x18f   :  { %v2312_v37 = vpack.c.bf16 %v1607_v43, %v1606_v51  ;;  %v1477_v38 = vmul.f32 %v3210_v57, %v1308_v35  ;;  %v1311_v54 = vadd.f32 %v2504_v55, %v1021_v34  ;;  %v1023_v13 = vpop.f32.mrb[63].mxu0  ;;  %v1302_v10 = vpop.f32.mrb[63].mxu1 }
 0x190   :  { %v2307_v41 = vpack.c.bf16 %v1605_v30, %v1604_v26  ;;  %v1475_v42 = vmul.f32 %v3210_v57, %v1300_v39  ;;  %v1303_v63 = vadd.f32 %v1302_v10, %v1013_v11 }
 0x191   :  { %2416 = vst [vmem:[%s3515_s3 + $0x68] sm:$0xff] %v2312_v37   ;;  %v1546_v19 = vadd.f32 %v3215_v1, %v1477_v38  ;;  %v1478_v27 = vmul.f32 %v3210_v57, %v1311_v54 }
 0x192   :  { %2415 = vst [vmem:[%s3515_s3 + $0x60] sm:$0xff] %v2307_v41   ;;  %v1544_v46 = vadd.f32 %v3215_v1, %v1475_v42  ;;  %v1476_v49 = vmul.f32 %v3210_v57, %v1303_v63 }
 0x193   :  { %v1547_v50 = vadd.f32 %v3215_v1, %v1478_v27  ;;  %v1610_v62 = vmax.f32 %v1546_v19, 0.0 }
 0x194   :  { %v1545_v23 = vadd.f32 %v3215_v1, %v1476_v49  ;;  %v1026_v58 = vpop.f32.mrb[64].mxu0  ;;  %v2507_v61 = vpop.f32.mrb[64].mxu1  ;;  %v1608_v53 = vmax.f32 %v1544_v46, 0.0 }
 0x195   :  { %v1611_v2 = vmax.f32 %v1547_v50, 0.0  ;;  %v1028_v11 = vpop.f32.mrb[65].mxu0  ;;  %v1315_v29 = vpop.f32.mrb[65].mxu1 }
 0x196   :  { %v1609_v3 = vmax.f32 %v1545_v23, 0.0  ;;  %v1316_v45 = vadd.f32 %v1315_v29, %v1026_v58  ;;  %v1029_v6 = vpop.f32.mrb[66].mxu0  ;;  %v2508_v15 = vpop.f32.mrb[66].mxu1 }
 0x197   :  { %v2322_v5 = vpack.c.bf16 %v1611_v2, %v1610_v62  ;;  %v1031_v7 = vpop.f32.mrb[67].mxu0  ;;  %v1318_v14 = vpop.f32.mrb[67].mxu1 }
 0x198   :  { %v2317_v9 = vpack.c.bf16 %v1609_v3, %v1608_v53  ;;  %v1479_v33 = vmul.f32 %v3210_v57, %v1316_v45  ;;  %v1319_v59 = vadd.f32 %v1318_v14, %v1029_v6 }
 0x199   :  { %2418 = vst [vmem:[%s3515_s3 + $0x78] sm:$0xff] %v2322_v5  }
 0x19a   :  { %2417 = vst [vmem:[%s3515_s3 + $0x70] sm:$0xff] %v2317_v9   ;;  %v1548_v17 = vadd.f32 %v3215_v1, %v1479_v33  ;;  %v1480_v18 = vmul.f32 %v3210_v57, %v1319_v59 }
 0x19c   :  { %v1549_v31 = vadd.f32 %v3215_v1, %v1480_v18  ;;  %v1034_v21 = vpop.f32.mrb[68].mxu0  ;;  %v2511_v22 = vpop.f32.mrb[68].mxu1  ;;  %v1612_v25 = vmax.f32 %v1548_v17, 0.0 }
 0x19d   :  { %v1324_v51 = vadd.f32 %v2507_v61, %v1034_v21  ;;  %v1036_v43 = vpop.f32.mrb[69].mxu0  ;;  %v1331_v35 = vpop.f32.mrb[69].mxu1 }
 0x19e   :  { %v1613_v47 = vmax.f32 %v1549_v31, 0.0  ;;  %v1037_v26 = vpop.f32.mrb[70].mxu0  ;;  %v2512_v30 = vpop.f32.mrb[70].mxu1 }
 0x19f   :  { %v1481_v39 = vmul.f32 %v3210_v57, %v1324_v51  ;;  %v1327_v34 = vadd.f32 %v2508_v15, %v1037_v26  ;;  %v1039_v55 = vpop.f32.mrb[71].mxu0  ;;  %v1334_v37 = vpop.f32.mrb[71].mxu1 }
 0x1a0   :  { %v2327_v38 = vpack.c.bf16 %v1613_v47, %v1612_v25 }
 0x1a1   :  { %v1550_v54 = vadd.f32 %v3215_v1, %v1481_v39  ;;  %v1482_v13 = vmul.f32 %v3210_v57, %v1327_v34 }
 0x1a2   :  { %2419 = vst [vmem:[%s3515_s3 + $0x80] sm:$0xff] %v2327_v38  }
 0x1a3   :  { %v1551_v10 = vadd.f32 %v3215_v1, %v1482_v13  ;;  %v1614_v63 = vmax.f32 %v1550_v54, 0.0 }
 0x1a4   :  { %v1042_v41 = vpop.f32.mrb[72].mxu0  ;;  %v3377_v42 = vpop.f32.mrb[72].mxu1 }
 0x1a5   :  { %v1615_v19 = vmax.f32 %v1551_v10, 0.0  ;;  %v1332_v27 = vadd.f32 %v1331_v35, %v1042_v41  ;;  %v1044_v46 = vpop.f32.mrb[73].mxu0  ;;  %v1347_v49 = vpop.f32.mrb[73].mxu1 }
 0x1a6   :  { %v1045_v50 = vpop.f32.mrb[74].mxu0  ;;  %v3379_v23 = vpop.f32.mrb[74].mxu1 }
 0x1a7   :  { %v2332_v58 = vpack.c.bf16 %v1615_v19, %v1614_v63  ;;  %v1483_v61 = vmul.f32 %v3210_v57, %v1332_v27  ;;  %v1335_v62 = vadd.f32 %v1334_v37, %v1045_v50  ;;  %v1047_v2 = vpop.f32.mrb[75].mxu0  ;;  %v1350_v11 = vpop.f32.mrb[75].mxu1 }
 0x1a9   :  { %2420 = vst [vmem:[%s3515_s3 + $0x88] sm:$0xff] %v2332_v58   ;;  %v1552_v29 = vadd.f32 %v3215_v1, %v1483_v61  ;;  %v1484_v53 = vmul.f32 %v3210_v57, %v1335_v62 }
 0x1ab   :  { %v1553_v3 = vadd.f32 %v3215_v1, %v1484_v53  ;;  %v1616_v15 = vmax.f32 %v1552_v29, 0.0 }
 0x1ac   :  { %v1050_v45 = vpop.f32.mrb[76].mxu0  ;;  %v3388_v6 = vpop.f32.mrb[76].mxu1 }
 0x1ad   :  { %v1617_v5 = vmax.f32 %v1553_v3, 0.0  ;;  %v1340_v7 = vadd.f32 %v2511_v22, %v1050_v45  ;;  %v1052_v14 = vpop.f32.mrb[77].mxu0  ;;  %v3390_v9 = vpop.f32.mrb[77].mxu1 }
 0x1ae   :  { %v1053_v33 = vpop.f32.mrb[78].mxu0  ;;  %v3392_v59 = vpop.f32.mrb[78].mxu1 }
 0x1af   :  { %v2337_v17 = vpack.c.bf16 %v1617_v5, %v1616_v15  ;;  %v1485_v18 = vmul.f32 %v3210_v57, %v1340_v7  ;;  %v1343_v31 = vadd.f32 %v2512_v30, %v1053_v33  ;;  %v1055_v21 = vpop.f32.mrb[79].mxu0  ;;  %v3395_v51 = vpop.f32.mrb[79].mxu1 }
 0x1b1   :  { %2421 = vst [vmem:[%s3515_s3 + $0x90] sm:$0xff] %v2337_v17   ;;  %v1554_v43 = vadd.f32 %v3215_v1, %v1485_v18  ;;  %v1486_v22 = vmul.f32 %v3210_v57, %v1343_v31 }
 0x1b3   :  { %v1555_v35 = vadd.f32 %v3215_v1, %v1486_v22  ;;  %v1618_v26 = vmax.f32 %v1554_v43, 0.0 }
 0x1b4   :  { %v1058_v25 = vpop.f32.mrb[80].mxu0  ;;  %v2523_v47 = vpop.f32.mrb[80].mxu1 }
 0x1b5   :  { %v1619_v39 = vmax.f32 %v1555_v35, 0.0  ;;  %v1348_v34 = vadd.f32 %v1347_v49, %v1058_v25  ;;  %v1388_v30 = vadd.f32 %v2523_v47, %v3151_v60  ;;  %v1060_v55 = vpop.f32.mrb[81].mxu0  ;;  %v1379_v37 = vpop.f32.mrb[81].mxu1 }
 0x1b6   :  { %v1380_v38 = vadd.f32 %v1379_v37, %v3145_v52  ;;  %v1061_v54 = vpop.f32.mrb[82].mxu0  ;;  %v2524_v13 = vpop.f32.mrb[82].mxu1 }
 0x1b7   :  { %v2342_v10 = vpack.c.bf16 %v1619_v39, %v1618_v26  ;;  %v1487_v41 = vmul.f32 %v3210_v57, %v1348_v34  ;;  %v1497_v63 = vmul.f32 %v3210_v57, %v1388_v30  ;;  %v1351_v19 = vadd.f32 %v1350_v11, %v1061_v54  ;;  %v1063_v27 = vpop.f32.mrb[83].mxu0  ;;  %v1382_v46 = vpop.f32.mrb[83].mxu1 }
 0x1b8   :  { %v1495_v50 = vmul.f32 %v3210_v57, %v1380_v38  ;;  %v1391_v49 = vadd.f32 %v2524_v13, %v3155_v0  ;;  %v1383_v60 = vadd.f32 %v1382_v46, %v3149_v56 }
 0x1b9   :  { %2422 = vst [vmem:[%s3515_s3 + $0x98] sm:$0xff] %v2342_v10   ;;  %v1556_v52 = vadd.f32 %v3215_v1, %v1487_v41  ;;  %v1566_v58 = vadd.f32 %v3215_v1, %v1497_v63  ;;  %v1488_v61 = vmul.f32 %v3210_v57, %v1351_v19 }
 0x1ba   :  { %v1564_v62 = vadd.f32 %v3215_v1, %v1495_v50  ;;  %v1498_v2 = vmul.f32 %v3210_v57, %v1391_v49  ;;  %v1496_v11 = vmul.f32 %v3210_v57, %v1383_v60 }
 0x1bb   :  { %v1557_v0 = vadd.f32 %v3215_v1, %v1488_v61  ;;  %v1620_v29 = vmax.f32 %v1556_v52, 0.0  ;;  %v1630_v15 = vmax.f32 %v1566_v58, 0.0 }
 0x1bc   :  { %v1567_v56 = vadd.f32 %v3215_v1, %v1498_v2  ;;  %v1565_v53 = vadd.f32 %v3215_v1, %v1496_v11  ;;  %v1066_v3 = vpop.f32.mrb[84].mxu0  ;;  %v2527_v45 = vpop.f32.mrb[84].mxu1  ;;  %v1628_v18 = vmax.f32 %v1564_v62, 0.0 }
 0x1bd   :  { %v1621_v5 = vmax.f32 %v1557_v0, 0.0  ;;  %v1356_v7 = vadd.f32 %v3377_v42, %v1066_v3  ;;  %v1404_v14 = vadd.f32 %v2527_v45, %v3167_v12  ;;  %v1068_v33 = vpop.f32.mrb[85].mxu0  ;;  %v1395_v17 = vpop.f32.mrb[85].mxu1 }
 0x1be   :  { %v1631_v31 = vmax.f32 %v1567_v56, 0.0  ;;  %v1629_v21 = vmax.f32 %v1565_v53, 0.0  ;;  %v1396_v43 = vadd.f32 %v1395_v17, %v3159_v4  ;;  %v1069_v22 = vpop.f32.mrb[86].mxu0  ;;  %v2528_v35 = vpop.f32.mrb[86].mxu1 }
 0x1bf   :  { %v2347_v25 = vpack.c.bf16 %v1621_v5, %v1620_v29  ;;  %v1489_v47 = vmul.f32 %v3210_v57, %v1356_v7  ;;  %v1501_v26 = vmul.f32 %v3210_v57, %v1404_v14  ;;  %v1359_v39 = vadd.f32 %v3379_v23, %v1069_v22  ;;  %v1071_v34 = vpop.f32.mrb[87].mxu0  ;;  %v1398_v42 = vpop.f32.mrb[87].mxu1 }
 0x1c0   :  { %v2372_v30 = vpack.c.bf16 %v1631_v31, %v1630_v15  ;;  %v2367_v12 = vpack.c.bf16 %v1629_v21, %v1628_v18  ;;  %v1499_v55 = vmul.f32 %v3210_v57, %v1396_v43  ;;  %v1407_v37 = vadd.f32 %v2528_v35, %v3171_v16 }
 0x1c1   :  { %2423 = vst [vmem:[%s3515_s3 + $0xa0] sm:$0xff] %v2347_v25   ;;  %v1558_v4 = vadd.f32 %v3215_v1, %v1489_v47  ;;  %v1490_v38 = vmul.f32 %v3210_v57, %v1359_v39  ;;  %v1399_v54 = vadd.f32 %v1398_v42, %v3163_v8  ;;  %v1570_v16 = vadd.f32 %v3215_v1, %v1501_v26 }
 0x1c2   :  { %2428 = vst [vmem:[%s3515_s3 + $0xc8] sm:$0xff] %v2372_v30   ;;  %2427 = vst [vmem:[%s3515_s3 + $0xc0] sm:$0xff] %v2367_v12   ;;  %v1568_v23 = vadd.f32 %v3215_v1, %v1499_v55  ;;  %v1502_v13 = vmul.f32 %v3210_v57, %v1407_v37 }
 0x1c3   :  { %v1559_v10 = vadd.f32 %v3215_v1, %v1490_v38  ;;  %v1500_v41 = vmul.f32 %v3210_v57, %v1399_v54  ;;  %v1622_v63 = vmax.f32 %v1558_v4, 0.0  ;;  %v1634_v61 = vmax.f32 %v1570_v16, 0.0 }
 0x1c4   :  { %v1571_v8 = vadd.f32 %v3215_v1, %v1502_v13  ;;  %v1074_v19 = vpop.f32.mrb[88].mxu0  ;;  %v2531_v27 = vpop.f32.mrb[88].mxu1  ;;  %v1632_v62 = vmax.f32 %v1568_v23, 0.0 }
 0x1c5   :  { %v1623_v46 = vmax.f32 %v1559_v10, 0.0  ;;  %v1569_v50 = vadd.f32 %v3215_v1, %v1500_v41  ;;  %v1364_v49 = vadd.f32 %v3390_v9, %v1074_v19  ;;  %v1420_v60 = vadd.f32 %v2531_v27, %v3183_v28  ;;  %v1076_v52 = vpop.f32.mrb[89].mxu0  ;;  %v1411_v58 = vpop.f32.mrb[89].mxu1 }
 0x1c6   :  { %v1635_v2 = vmax.f32 %v1571_v8, 0.0  ;;  %v1412_v11 = vadd.f32 %v1411_v58, %v3175_v20  ;;  %v1077_v0 = vpop.f32.mrb[90].mxu0  ;;  %v2532_v29 = vpop.f32.mrb[90].mxu1 }
 0x1c7   :  { %v2352_v56 = vpack.c.bf16 %v1623_v46, %v1622_v63  ;;  %v1633_v53 = vmax.f32 %v1569_v50, 0.0  ;;  %v1491_v3 = vmul.f32 %v3210_v57, %v1364_v49  ;;  %v1505_v45 = vmul.f32 %v3210_v57, %v1420_v60  ;;  %v1079_v15 = vpop.f32.mrb[91].mxu0  ;;  %v1414_v5 = vpop.f32.mrb[91].mxu1 }
 0x1c8   :  { %v2382_v9 = vpack.c.bf16 %v1635_v2, %v1634_v61  ;;  %v1503_v28 = vmul.f32 %v3210_v57, %v1412_v11  ;;  %v1367_v7 = vadd.f32 %v3395_v51, %v1077_v0  ;;  %v1423_v14 = vadd.f32 %v2532_v29, %v3187_v32 }
 0x1c9   :  { %2424 = vst [vmem:[%s3515_s3 + $0xa8] sm:$0xff] %v2352_v56   ;;  %v2377_v20 = vpack.c.bf16 %v1633_v53, %v1632_v62  ;;  %v1560_v33 = vadd.f32 %v3215_v1, %v1491_v3  ;;  %v1574_v17 = vadd.f32 %v3215_v1, %v1505_v45  ;;  %v1415_v18 = vadd.f32 %v1414_v5, %v3179_v24 }
 0x1ca   :  { %2430 = vst [vmem:[%s3515_s3 + $0xd8] sm:$0xff] %v2382_v9   ;;  %v1572_v31 = vadd.f32 %v3215_v1, %v1503_v28  ;;  %v1492_v51 = vmul.f32 %v3210_v57, %v1367_v7  ;;  %v1506_v32 = vmul.f32 %v3210_v57, %v1423_v14 }
 0x1cb   :  { %2429 = vst [vmem:[%s3515_s3 + $0xd0] sm:$0xff] %v2377_v20   ;;  %v1504_v21 = vmul.f32 %v3210_v57, %v1415_v18  ;;  %v1624_v43 = vmax.f32 %v1560_v33, 0.0  ;;  %v1638_v47 = vmax.f32 %v1574_v17, 0.0 }
 0x1cc   :  { %v1561_v22 = vadd.f32 %v3215_v1, %v1492_v51  ;;  %v1575_v24 = vadd.f32 %v3215_v1, %v1506_v32  ;;  %v1082_v35 = vpop.f32.mrb[92].mxu0  ;;  %v2535_v25 = vpop.f32.mrb[92].mxu1  ;;  %v1636_v12 = vmax.f32 %v1572_v31, 0.0 }
 0x1cd   :  { %v1573_v26 = vadd.f32 %v3215_v1, %v1504_v21  ;;  %v1372_v39 = vadd.f32 %v3388_v6, %v1082_v35  ;;  %v1436_v34 = vadd.f32 %v2535_v25, %v3199_v44  ;;  %v1084_v42 = vpop.f32.mrb[93].mxu0  ;;  %v1427_v30 = vpop.f32.mrb[93].mxu1 }
 0x1ce   :  { %v1625_v55 = vmax.f32 %v1561_v22, 0.0  ;;  %v1639_v37 = vmax.f32 %v1575_v24, 0.0  ;;  %v1428_v4 = vadd.f32 %v1427_v30, %v3191_v36  ;;  %v1085_v38 = vpop.f32.mrb[94].mxu0  ;;  %v2536_v54 = vpop.f32.mrb[94].mxu1 }
 0x1cf   :  { %v1637_v16 = vmax.f32 %v1573_v26, 0.0  ;;  %v1493_v23 = vmul.f32 %v3210_v57, %v1372_v39  ;;  %v1509_v13 = vmul.f32 %v3210_v57, %v1436_v34  ;;  %v1375_v10 = vadd.f32 %v3392_v59, %v1085_v38  ;;  %v1087_v41 = vpop.f32.mrb[95].mxu0  ;;  %v1430_v6 = vpop.f32.mrb[95].mxu1 }
 0x1d0   :  { %v2357_v63 = vpack.c.bf16 %v1625_v55, %v1624_v43  ;;  %v2392_v44 = vpack.c.bf16 %v1639_v37, %v1638_v47  ;;  %v1507_v8 = vmul.f32 %v3210_v57, %v1428_v4  ;;  %v1439_v19 = vadd.f32 %v2536_v54, %v3203_v48 }
 0x1d1   :  { %v2387_v27 = vpack.c.bf16 %v1637_v16, %v1636_v12  ;;  %v1562_v36 = vadd.f32 %v3215_v1, %v1493_v23  ;;  %v1494_v46 = vmul.f32 %v3210_v57, %v1375_v10  ;;  %v1578_v59 = vadd.f32 %v3215_v1, %v1509_v13 }
 0x1d2   :  { %2425 = vst [vmem:[%s3515_s3 + $0xb0] sm:$0xff] %v2357_v63   ;;  %2432 = vst [vmem:[%s3515_s3 + $0xe8] sm:$0xff] %v2392_v44   ;;  %v1510_v50 = vmul.f32 %v3210_v57, %v1439_v19  ;;  %v1431_v49 = vadd.f32 %v1430_v6, %v3195_v40  ;;  %v1576_v60 = vadd.f32 %v3215_v1, %v1507_v8 }
 0x1d3   :  { %2431 = vst [vmem:[%s3515_s3 + $0xe0] sm:$0xff] %v2387_v27   ;;  %v1563_v48 = vadd.f32 %v3215_v1, %v1494_v46  ;;  %v1626_v61 = vmax.f32 %v1562_v36, 0.0  ;;  %v1642_v2 = vmax.f32 %v1578_v59, 0.0 }
 0x1d4   :  { %v1579_v52 = vadd.f32 %v3215_v1, %v1510_v50  ;;  %v1508_v58 = vmul.f32 %v3210_v57, %v1431_v49  ;;  %v1640_v40 = vmax.f32 %v1576_v60, 0.0 }
 0x1d5   :  { %v1627_v62 = vmax.f32 %v1563_v48, 0.0 }
 0x1d6   :  { %v1643_v11 = vmax.f32 %v1579_v52, 0.0  ;;  %v1577_v0 = vadd.f32 %v3215_v1, %v1508_v58 }
 0x1d7   :  { %v2362_v29 = vpack.c.bf16 %v1627_v62, %v1626_v61 }
 0x1d8   :  { %v2402_v56 = vpack.c.bf16 %v1643_v11, %v1642_v2  ;;  %v1641_v53 = vmax.f32 %v1577_v0, 0.0 }
 0x1d9   :  { %2426 = vst [vmem:[%s3515_s3 + $0xb8] sm:$0xff] %v2362_v29  }
 0x1da   :  { %2434 = vst [vmem:[%s3515_s3 + $0xf8] sm:$0xff] %v2402_v56   ;;  %v2397_v3 = vpack.c.bf16 %v1641_v53, %v1640_v40 }
 0x1dc   :  { %2433 = vst [vmem:[%s3515_s3 + $0xf0] sm:$0xff] %v2397_v3  }

</bundles_post_ra>
